<compile_context>
chip_gen: v7x
topology: tpu7x:2x2x1
jax: 0.10.0
libtpu: 0.0.40
codegen_flags: <defaults>
</compile_context>

<pallas_src>
import jax
import jax.numpy as jnp
from jax import lax
from jax.experimental import pallas as pl
from jax.experimental.pallas import tpu as pltpu

INPUT_DIM = 40
HIDDEN_DIM = 64
HALF_DIM = HIDDEN_DIM // 2
OUT_DIM = 1
LN_EPS = 1e-5
LEAKY_SLOPE = 0.01  # F.leaky_relu default negative_slope


def _leaky_relu(h):
    # max(y, a*y) == leaky_relu(y) for 0 < a < 1; 2 VALU ops (mul + max).
    return jnp.maximum(h, LEAKY_SLOPE * h)


def _layernorm_two_pass(h, gamma, beta):
    # Pure-JAX reference form (matches PyTorch nn.LayerNorm).
    mean = jnp.mean(h, axis=-1, keepdims=True)
    var = jnp.mean((h - mean) ** 2, axis=-1, keepdims=True)
    return (h - mean) * lax.rsqrt(var + LN_EPS) * gamma + beta


def ff_kernel(x_ref,
              w1_ref, b1_ref, g1_ref, be1_ref,
              w2_ref, b2_ref, g2_ref, be2_ref,
              w3_ref, ones1_ref, ones2_ref,
              b3_ref,
              o_ref):

    def ln_leaky(h, ones_div_ref, g_ref, be_ref):
        # MXU statistics: ones_div is (H, H) filled with 1/H, so
        #   h @ ones_div       == row-mean, pre-broadcast to every lane
        #   (h*h) @ ones_div   == row-mean of squares, pre-broadcast
        # -> zero XLU reductions and zero lane broadcasts in the LN.
        ones_div = ones_div_ref[...]
        mean = jnp.dot(h, ones_div, preferred_element_type=jnp.float32)
        mean_sq = jnp.dot(h * h, ones_div, preferred_element_type=jnp.float32)
        # Single-pass variance; clamp >= 0 to guard cancellation / padded rows.
        var = jnp.maximum(mean_sq - mean * mean, 0.0)
        inv_std = lax.rsqrt(var + LN_EPS)                       # EUP slot
        y = (h - mean) * (inv_std * g_ref[...]) + be_ref[...]   # 4 VALU ops
        return _leaky_relu(y)

    x = x_ref[...]

    # fc1 (MXU) + layer_norm1 + leaky_relu    (dropout1 = identity in eval)
    h = jnp.dot(x, w1_ref[...], preferred_element_type=jnp.float32)
    h = h + b1_ref[...]
    h = ln_leaky(h, ones1_ref, g1_ref, be1_ref)

    # fc2 (MXU) + layer_norm2 + leaky_relu    (dropout2 = identity in eval)
    h = jnp.dot(h.astype(w2_ref.dtype), w2_ref[...],
                preferred_element_type=jnp.float32)
    h = h + b2_ref[...]
    h = ln_leaky(h, ones2_ref, g2_ref, be2_ref)

    # fc3: N=1.  Contract w3 (1, HALF) against h's feature (last) axis --
    # the MXU-native transposed-B path -- so the result is produced directly
    # as a lane-dense (1, tile_b) row -> full-lane, unmasked store.
    out_row = lax.dot_general(
        w3_ref[...], h,
        dimension_numbers=(((1,), (1,)), ((), ())),
        preferred_element_type=jnp.float32)            # (1, tile_b)
    out_row = out_row + b3_ref[0]                       # scalar bias from SMEM
    o_ref[...] = out_row.reshape(o_ref.shape).astype(o_ref.dtype)


def _round_up(n, m):
    return ((n + m - 1) // m) * m


def feed_forward_model(x, params, *, tile_b=4096, matmul_dtype=jnp.float32,
                       vmem_limit_bytes=None):
    """x: [B, INPUT_DIM] float32 -> [B, 1] float32.

    tile_b: batch rows per grid step (multiple of 128).  Arbitrary B is
    handled by zero-padding.  The grid is kept >= 2 steps whenever B > 128
    so v7x's two TensorCores both get work from the "parallel" batch axis.
    matmul_dtype=bfloat16 halves the dominant HBM stream and feeds bf16 MXU
    operands on ALL generations (v5e/v6e/v7x); LN/bias/activation math stays
    f32 in-kernel.  When pushing tile_b toward 8-16K rows, budget
    vmem_limit_bytes against v7x's 64 MiB physical VMEM explicitly.
    """
    B, D = x.shape
    assert D == INPUT_DIM

    tile_b = int(tile_b)
    if B > 128:
        # >= 2 grid steps for v7x dual-TC; on 1-TC v5e/v6e this only costs
        # one extra ~0.35us grid step.
        tile_b = min(tile_b, _round_up(pl.cdiv(B, 2), 128))
    tile_b = min(tile_b, _round_up(B, 128))
    tile_b = max(128, (tile_b // 128) * 128)
    num_tiles = pl.cdiv(B, tile_b)
    b_pad = num_tiles * tile_b

    (w1, b1, g1, be1, w2, b2, g2, be2, w3, b3) = params

    if b_pad != B:
        x = jnp.pad(x, ((0, b_pad - B), (0, 0)))
    if matmul_dtype != jnp.float32:
        x = x.astype(matmul_dtype)
        w1 = w1.astype(matmul_dtype)
        w2 = w2.astype(matmul_dtype)

    # Constant (H, H) "1/H" matrices used to compute LN statistics on the MXU.
    ones1 = jnp.full((HIDDEN_DIM, HIDDEN_DIM), 1.0 / HIDDEN_DIM, jnp.float32)
    ones2 = jnp.full((HALF_DIM, HALF_DIM), 1.0 / HALF_DIM, jnp.float32)
    # fc3 bias as a single SMEM scalar.
    b3_s = jnp.asarray(b3, jnp.float32).reshape((OUT_DIM,))

    if vmem_limit_bytes is None:
        # Lane-padded budget: double-buffered x tile + ~8 live f32 temps/row
        # (D=40/H=64/HALF=32 all pad to 128 lanes) + headroom.
        x_itemsize = 4 if matmul_dtype == jnp.float32 else 2
        x_bytes = tile_b * 128 * x_itemsize
        act_bytes = tile_b * 128 * 4
        vmem_limit_bytes = max(2 * x_bytes + 8 * act_bytes + (2 << 20), 32 << 20)

    def const_spec(shape):
        # Tiny parameters: full-extent blocks, constant index map -> they
        # stay VMEM-resident across grid steps (no re-DMA).
        return pl.BlockSpec(shape, lambda i: (0,) * len(shape))

    out = pl.pallas_call(
        ff_kernel,
        out_shape=jax.ShapeDtypeStruct((num_tiles, 1, tile_b), jnp.float32),
        grid=(num_tiles,),
        in_specs=[
            pl.BlockSpec((tile_b, INPUT_DIM), lambda i: (i, 0)),   # x
            const_spec((INPUT_DIM, HIDDEN_DIM)),                   # w1
            const_spec((1, HIDDEN_DIM)),                           # b1
            const_spec((1, HIDDEN_DIM)),                           # gamma1
            const_spec((1, HIDDEN_DIM)),                           # beta1
            const_spec((HIDDEN_DIM, HALF_DIM)),                    # w2
            const_spec((1, HALF_DIM)),                             # b2
            const_spec((1, HALF_DIM)),                             # gamma2
            const_spec((1, HALF_DIM)),                             # beta2
            const_spec((OUT_DIM, HALF_DIM)),                       # w3 (out,in)
            const_spec((HIDDEN_DIM, HIDDEN_DIM)),                  # ones1 (1/64)
            const_spec((HALF_DIM, HALF_DIM)),                      # ones2 (1/32)
            pl.BlockSpec(memory_space=pltpu.MemorySpace.SMEM),     # b3 scalar
        ],
        # Lane-dense output: one (1, tile_b) row per grid step.
        out_specs=pl.BlockSpec((1, 1, tile_b), lambda i: (i, 0, 0)),
        compiler_params=pltpu.CompilerParams(
            dimension_semantics=("parallel",),
            vmem_limit_bytes=int(vmem_limit_bytes)),
    )(x, w1, b1, g1, be1, w2, b2, g2, be2, w3, ones1, ones2, b3_s)

    # (num_tiles, 1, tile_b) -> (b_pad, 1) -> drop padded rows.
    return out.reshape(b_pad, 1)[:B]


def init_params(key):
    """Deterministic parameter init (nn.Linear-style uniform, LN: ones/zeros)."""
    ks = jax.random.split(key, 6)

    def linear_t(kw, kb, fan_in, fan_out):
        bound = 1.0 / float(fan_in) ** 0.5
        # Stored already transposed to [in, out] so the kernel does x @ W.
        w = jax.random.uniform(kw, (fan_in, fan_out), jnp.float32, -bound, bound)
        b = jax.random.uniform(kb, (1, fan_out), jnp.float32, -bound, bound)
        return w, b

    w1, b1 = linear_t(ks[0], ks[1], INPUT_DIM, HIDDEN_DIM)
    w2, b2 = linear_t(ks[2], ks[3], HIDDEN_DIM, HALF_DIM)
    # fc3 kept in PyTorch's native (out, in) layout; the kernel contracts it
    # against h's feature axis to produce a lane-dense (1, tile_b) result.
    bound3 = 1.0 / float(HALF_DIM) ** 0.5
    w3 = jax.random.uniform(ks[4], (OUT_DIM, HALF_DIM), jnp.float32, -bound3, bound3)
    b3 = jax.random.uniform(ks[5], (OUT_DIM, OUT_DIM), jnp.float32, -bound3, bound3)
    g1 = jnp.ones((1, HIDDEN_DIM), jnp.float32)
    be1 = jnp.zeros((1, HIDDEN_DIM), jnp.float32)
    g2 = jnp.ones((1, HALF_DIM), jnp.float32)
    be2 = jnp.zeros((1, HALF_DIM), jnp.float32)
    return (w1, b1, g1, be1, w2, b2, g2, be2, w3, b3)


def reference(x, params, matmul_dtype=jnp.float32):
    """Pure-JAX reference of the PyTorch forward (eval mode)."""
    (w1, b1, g1, be1, w2, b2, g2, be2, w3, b3) = params
    h = jnp.dot(x.astype(matmul_dtype), w1.astype(matmul_dtype),
                preferred_element_type=jnp.float32) + b1
    h = _leaky_relu(_layernorm_two_pass(h, g1, be1))
    h = jnp.dot(h.astype(matmul_dtype), w2.astype(matmul_dtype),
                preferred_element_type=jnp.float32) + b2
    h = _leaky_relu(_layernorm_two_pass(h, g2, be2))
    return jnp.dot(h, w3.T, preferred_element_type=jnp.float32) + b3


if __name__ == "__main__":
    key = jax.random.PRNGKey(0)
    k_x, k_p = jax.random.split(key)

    # Deliberately NOT a multiple of the tile: exercises the zero-padding path
    # and (with the default tile) the forced 2-step "parallel" grid.
    B = 300
    x = jax.random.normal(k_x, (B, INPUT_DIM), jnp.float32)
    params = init_params(k_p)

    # f32 path, default tile -> clamped to 256 rows, 2 grid steps.
    out = jax.block_until_ready(feed_forward_model(x, params))
    ref = reference(x, params)
    assert out.shape == (B, OUT_DIM)
    # Tolerance covers the single-pass variance + MXU-matmul LN statistics
    # vs the two-pass jnp.mean reference.
    assert jnp.allclose(out, ref, atol=5e-3, rtol=5e-3), "f32 mismatch vs reference"

    # bf16 matmul-input path (recommended on v5e/v6e/v7x), small tile -> 3-step
    # grid.  Checked against a reference that quantizes the same operands so
    # only kernel-side op-ordering / LN-statistics differences remain.
    out_bf16 = jax.block_until_ready(
        feed_forward_model(x, params, tile_b=128, matmul_dtype=jnp.bfloat16))
    ref_bf16 = reference(x, params, matmul_dtype=jnp.bfloat16)
    assert jnp.allclose(out_bf16, ref_bf16, atol=2.5e-2, rtol=2.5e-2), "bf16 mismatch"

    # TODO(synk): dropout1/dropout2 omitted (identity) — PyTorch eval() semantics.
    print("KERNEL_OK")
</pallas_src>

<mosaic_0001>
module attributes {stable_mosaic.version = 11 : i64} {
  func.func @ff_kernel(%arg0: i32, %arg1: memref<256x40xf32, #tpu.memory_space<vmem>>, %arg2: memref<40x64xf32, #tpu.memory_space<vmem>>, %arg3: memref<1x64xf32, #tpu.memory_space<vmem>>, %arg4: memref<1x64xf32, #tpu.memory_space<vmem>>, %arg5: memref<1x64xf32, #tpu.memory_space<vmem>>, %arg6: memref<64x32xf32, #tpu.memory_space<vmem>>, %arg7: memref<1x32xf32, #tpu.memory_space<vmem>>, %arg8: memref<1x32xf32, #tpu.memory_space<vmem>>, %arg9: memref<1x32xf32, #tpu.memory_space<vmem>>, %arg10: memref<1x32xf32, #tpu.memory_space<vmem>>, %arg11: memref<64x64xf32, #tpu.memory_space<vmem>>, %arg12: memref<32x32xf32, #tpu.memory_space<vmem>>, %arg13: memref<1xf32, #tpu.memory_space<smem>>, %arg14: memref<1x1x256xf32, #tpu.memory_space<vmem>>) attributes {dimension_semantics = [#tpu.dimension_semantics<parallel>], iteration_bounds = array<i64: 2>, scalar_prefetch = 0 : i64, scratch_operands = 0 : i64, tpu.core_type = #tpu.core_type<tc>, window_params = [{transform_indices = @transform_0, window_bounds = array<i64: 256, 40>}, {pipeline_mode = #tpu.pipeline_mode<synchronous>, transform_indices = @transform_1, window_bounds = array<i64: 40, 64>}, {pipeline_mode = #tpu.pipeline_mode<synchronous>, transform_indices = @transform_2, window_bounds = array<i64: 1, 64>}, {pipeline_mode = #tpu.pipeline_mode<synchronous>, transform_indices = @transform_3, window_bounds = array<i64: 1, 64>}, {pipeline_mode = #tpu.pipeline_mode<synchronous>, transform_indices = @transform_4, window_bounds = array<i64: 1, 64>}, {pipeline_mode = #tpu.pipeline_mode<synchronous>, transform_indices = @transform_5, window_bounds = array<i64: 64, 32>}, {pipeline_mode = #tpu.pipeline_mode<synchronous>, transform_indices = @transform_6, window_bounds = array<i64: 1, 32>}, {pipeline_mode = #tpu.pipeline_mode<synchronous>, transform_indices = @transform_7, window_bounds = array<i64: 1, 32>}, {pipeline_mode = #tpu.pipeline_mode<synchronous>, transform_indices = @transform_8, window_bounds = array<i64: 1, 32>}, {pipeline_mode = #tpu.pipeline_mode<synchronous>, transform_indices = @transform_9, window_bounds = array<i64: 1, 32>}, {pipeline_mode = #tpu.pipeline_mode<synchronous>, transform_indices = @transform_10, window_bounds = array<i64: 64, 64>}, {pipeline_mode = #tpu.pipeline_mode<synchronous>, transform_indices = @transform_11, window_bounds = array<i64: 32, 32>}, {transform_indices = @transform_12, window_bounds = array<i64: 1>}, {transform_indices = @transform_13, window_bounds = array<i64: 1, 1, 256>}]} {
    %c0 = arith.constant 0 : index
    %c0_0 = arith.constant 0 : index
    %0 = vector.load %arg1[%c0, %c0_0] : memref<256x40xf32, #tpu.memory_space<vmem>>, vector<256x40xf32>
    %c0_1 = arith.constant 0 : index
    %c0_2 = arith.constant 0 : index
    %1 = vector.load %arg2[%c0_1, %c0_2] : memref<40x64xf32, #tpu.memory_space<vmem>>, vector<40x64xf32>
    %cst = arith.constant dense<0.000000e+00> : vector<256x64xf32>
    %2 = tpu.matmul %0, %1, %cst {dimension_numbers = #tpu.dot_dimension_numbers<[1], [0], [0], [1], [0, 0, 1, 1], [], []>} : vector<256x40xf32>, vector<40x64xf32>, vector<256x64xf32> -> vector<256x64xf32>
    %c0_3 = arith.constant 0 : index
    %c0_4 = arith.constant 0 : index
    %3 = vector.load %arg3[%c0_3, %c0_4] : memref<1x64xf32, #tpu.memory_space<vmem>>, vector<1x64xf32>
    %4 = vector.broadcast %3 : vector<1x64xf32> to vector<256x64xf32>
    %5 = arith.addf %2, %4 : vector<256x64xf32>
    %c0_5 = arith.constant 0 : index
    %c0_6 = arith.constant 0 : index
    %6 = vector.load %arg11[%c0_5, %c0_6] : memref<64x64xf32, #tpu.memory_space<vmem>>, vector<64x64xf32>
    %cst_7 = arith.constant dense<0.000000e+00> : vector<256x64xf32>
    %7 = tpu.matmul %5, %6, %cst_7 {dimension_numbers = #tpu.dot_dimension_numbers<[1], [0], [0], [1], [0, 0, 1, 1], [], []>} : vector<256x64xf32>, vector<64x64xf32>, vector<256x64xf32> -> vector<256x64xf32>
    %8 = arith.mulf %5, %5 : vector<256x64xf32>
    %cst_8 = arith.constant dense<0.000000e+00> : vector<256x64xf32>
    %9 = tpu.matmul %8, %6, %cst_8 {dimension_numbers = #tpu.dot_dimension_numbers<[1], [0], [0], [1], [0, 0, 1, 1], [], []>} : vector<256x64xf32>, vector<64x64xf32>, vector<256x64xf32> -> vector<256x64xf32>
    %10 = arith.mulf %7, %7 : vector<256x64xf32>
    %11 = arith.subf %9, %10 : vector<256x64xf32>
    %cst_9 = arith.constant 0.000000e+00 : f32
    %12 = vector.broadcast %cst_9 : f32 to vector<256x64xf32>
    %13 = arith.maximumf %11, %12 : vector<256x64xf32>
    %cst_10 = arith.constant 9.99999974E-6 : f32
    %14 = vector.broadcast %cst_10 : f32 to vector<256x64xf32>
    %15 = arith.addf %13, %14 : vector<256x64xf32>
    %16 = math.rsqrt %15 : vector<256x64xf32>
    %17 = arith.subf %5, %7 : vector<256x64xf32>
    %c0_11 = arith.constant 0 : index
    %c0_12 = arith.constant 0 : index
    %18 = vector.load %arg4[%c0_11, %c0_12] : memref<1x64xf32, #tpu.memory_space<vmem>>, vector<1x64xf32>
    %19 = vector.broadcast %18 : vector<1x64xf32> to vector<256x64xf32>
    %20 = arith.mulf %16, %19 : vector<256x64xf32>
    %21 = arith.mulf %17, %20 : vector<256x64xf32>
    %c0_13 = arith.constant 0 : index
    %c0_14 = arith.constant 0 : index
    %22 = vector.load %arg5[%c0_13, %c0_14] : memref<1x64xf32, #tpu.memory_space<vmem>>, vector<1x64xf32>
    %23 = vector.broadcast %22 : vector<1x64xf32> to vector<256x64xf32>
    %24 = arith.addf %21, %23 : vector<256x64xf32>
    %cst_15 = arith.constant 0.00999999977 : f32
    %25 = vector.broadcast %cst_15 : f32 to vector<256x64xf32>
    %26 = arith.mulf %25, %24 : vector<256x64xf32>
    %27 = arith.maximumf %24, %26 : vector<256x64xf32>
    %c0_16 = arith.constant 0 : index
    %c0_17 = arith.constant 0 : index
    %28 = vector.load %arg6[%c0_16, %c0_17] : memref<64x32xf32, #tpu.memory_space<vmem>>, vector<64x32xf32>
    %cst_18 = arith.constant dense<0.000000e+00> : vector<256x32xf32>
    %29 = tpu.matmul %27, %28, %cst_18 {dimension_numbers = #tpu.dot_dimension_numbers<[1], [0], [0], [1], [0, 0, 1, 1], [], []>} : vector<256x64xf32>, vector<64x32xf32>, vector<256x32xf32> -> vector<256x32xf32>
    %c0_19 = arith.constant 0 : index
    %c0_20 = arith.constant 0 : index
    %30 = vector.load %arg7[%c0_19, %c0_20] : memref<1x32xf32, #tpu.memory_space<vmem>>, vector<1x32xf32>
    %31 = vector.broadcast %30 : vector<1x32xf32> to vector<256x32xf32>
    %32 = arith.addf %29, %31 : vector<256x32xf32>
    %c0_21 = arith.constant 0 : index
    %c0_22 = arith.constant 0 : index
    %33 = vector.load %arg12[%c0_21, %c0_22] : memref<32x32xf32, #tpu.memory_space<vmem>>, vector<32x32xf32>
    %cst_23 = arith.constant dense<0.000000e+00> : vector<256x32xf32>
    %34 = tpu.matmul %32, %33, %cst_23 {dimension_numbers = #tpu.dot_dimension_numbers<[1], [0], [0], [1], [0, 0, 1, 1], [], []>} : vector<256x32xf32>, vector<32x32xf32>, vector<256x32xf32> -> vector<256x32xf32>
    %35 = arith.mulf %32, %32 : vector<256x32xf32>
    %cst_24 = arith.constant dense<0.000000e+00> : vector<256x32xf32>
    %36 = tpu.matmul %35, %33, %cst_24 {dimension_numbers = #tpu.dot_dimension_numbers<[1], [0], [0], [1], [0, 0, 1, 1], [], []>} : vector<256x32xf32>, vector<32x32xf32>, vector<256x32xf32> -> vector<256x32xf32>
    %37 = arith.mulf %34, %34 : vector<256x32xf32>
    %38 = arith.subf %36, %37 : vector<256x32xf32>
    %cst_25 = arith.constant 0.000000e+00 : f32
    %39 = vector.broadcast %cst_25 : f32 to vector<256x32xf32>
    %40 = arith.maximumf %38, %39 : vector<256x32xf32>
    %cst_26 = arith.constant 9.99999974E-6 : f32
    %41 = vector.broadcast %cst_26 : f32 to vector<256x32xf32>
    %42 = arith.addf %40, %41 : vector<256x32xf32>
    %43 = math.rsqrt %42 : vector<256x32xf32>
    %44 = arith.subf %32, %34 : vector<256x32xf32>
    %c0_27 = arith.constant 0 : index
    %c0_28 = arith.constant 0 : index
    %45 = vector.load %arg8[%c0_27, %c0_28] : memref<1x32xf32, #tpu.memory_space<vmem>>, vector<1x32xf32>
    %46 = vector.broadcast %45 : vector<1x32xf32> to vector<256x32xf32>
    %47 = arith.mulf %43, %46 : vector<256x32xf32>
    %48 = arith.mulf %44, %47 : vector<256x32xf32>
    %c0_29 = arith.constant 0 : index
    %c0_30 = arith.constant 0 : index
    %49 = vector.load %arg9[%c0_29, %c0_30] : memref<1x32xf32, #tpu.memory_space<vmem>>, vector<1x32xf32>
    %50 = vector.broadcast %49 : vector<1x32xf32> to vector<256x32xf32>
    %51 = arith.addf %48, %50 : vector<256x32xf32>
    %cst_31 = arith.constant 0.00999999977 : f32
    %52 = vector.broadcast %cst_31 : f32 to vector<256x32xf32>
    %53 = arith.mulf %52, %51 : vector<256x32xf32>
    %54 = arith.maximumf %51, %53 : vector<256x32xf32>
    %c0_32 = arith.constant 0 : index
    %c0_33 = arith.constant 0 : index
    %55 = vector.load %arg10[%c0_32, %c0_33] : memref<1x32xf32, #tpu.memory_space<vmem>>, vector<1x32xf32>
    %cst_34 = arith.constant dense<0.000000e+00> : vector<1x256xf32>
    %56 = tpu.matmul %55, %54, %cst_34 {dimension_numbers = #tpu.dot_dimension_numbers<[1], [1], [0], [0], [0, 0, 1, 0], [], []>} : vector<1x32xf32>, vector<256x32xf32>, vector<1x256xf32> -> vector<1x256xf32>
    %c0_35 = arith.constant 0 : index
    %57 = memref.load %arg13[%c0_35] : memref<1xf32, #tpu.memory_space<smem>>
    %58 = vector.broadcast %57 : f32 to vector<1x256xf32>
    %59 = arith.addf %56, %58 : vector<1x256xf32>
    %60 = vector.shape_cast %59 : vector<1x256xf32> to vector<1x1x256xf32>
    %c0_36 = arith.constant 0 : index
    %c0_37 = arith.constant 0 : index
    %c0_38 = arith.constant 0 : index
    %61 = vector.load %arg14[%c0_36, %c0_37, %c0_38] : memref<1x1x256xf32, #tpu.memory_space<vmem>>, vector<1x1x256xf32>
    tpu.vector_store %arg14[%c0_36, %c0_37, %c0_38], %60 {strides = array<i32>} : memref<1x1x256xf32, #tpu.memory_space<vmem>>, vector<1x1x256xf32>,
    return
  }
  func.func @transform_0(%arg0: i32) -> (i32, i32) {
    %c0_i32 = arith.constant 0 : i32
    %c0_i32_0 = arith.constant 0 : i32
    return %arg0, %c0_i32 : i32, i32
  }
  func.func @transform_1(%arg0: i32) -> (i32, i32) {
    %c0_i32 = arith.constant 0 : i32
    %c0_i32_0 = arith.constant 0 : i32
    %c0_i32_1 = arith.constant 0 : i32
    return %c0_i32, %c0_i32_0 : i32, i32
  }
  func.func @transform_2(%arg0: i32) -> (i32, i32) {
    %c0_i32 = arith.constant 0 : i32
    %c0_i32_0 = arith.constant 0 : i32
    %c0_i32_1 = arith.constant 0 : i32
    return %c0_i32, %c0_i32_0 : i32, i32
  }
  func.func @transform_3(%arg0: i32) -> (i32, i32) {
    %c0_i32 = arith.constant 0 : i32
    %c0_i32_0 = arith.constant 0 : i32
    %c0_i32_1 = arith.constant 0 : i32
    return %c0_i32, %c0_i32_0 : i32, i32
  }
  func.func @transform_4(%arg0: i32) -> (i32, i32) {
    %c0_i32 = arith.constant 0 : i32
    %c0_i32_0 = arith.constant 0 : i32
    %c0_i32_1 = arith.constant 0 : i32
    return %c0_i32, %c0_i32_0 : i32, i32
  }
  func.func @transform_5(%arg0: i32) -> (i32, i32) {
    %c0_i32 = arith.constant 0 : i32
    %c0_i32_0 = arith.constant 0 : i32
    %c0_i32_1 = arith.constant 0 : i32
    return %c0_i32, %c0_i32_0 : i32, i32
  }
  func.func @transform_6(%arg0: i32) -> (i32, i32) {
    %c0_i32 = arith.constant 0 : i32
    %c0_i32_0 = arith.constant 0 : i32
    %c0_i32_1 = arith.constant 0 : i32
    return %c0_i32, %c0_i32_0 : i32, i32
  }
  func.func @transform_7(%arg0: i32) -> (i32, i32) {
    %c0_i32 = arith.constant 0 : i32
    %c0_i32_0 = arith.constant 0 : i32
    %c0_i32_1 = arith.constant 0 : i32
    return %c0_i32, %c0_i32_0 : i32, i32
  }
  func.func @transform_8(%arg0: i32) -> (i32, i32) {
    %c0_i32 = arith.constant 0 : i32
    %c0_i32_0 = arith.constant 0 : i32
    %c0_i32_1 = arith.constant 0 : i32
    return %c0_i32, %c0_i32_0 : i32, i32
  }
  func.func @transform_9(%arg0: i32) -> (i32, i32) {
    %c0_i32 = arith.constant 0 : i32
    %c0_i32_0 = arith.constant 0 : i32
    %c0_i32_1 = arith.constant 0 : i32
    return %c0_i32, %c0_i32_0 : i32, i32
  }
  func.func @transform_10(%arg0: i32) -> (i32, i32) {
    %c0_i32 = arith.constant 0 : i32
    %c0_i32_0 = arith.constant 0 : i32
    %c0_i32_1 = arith.constant 0 : i32
    return %c0_i32, %c0_i32_0 : i32, i32
  }
  func.func @transform_11(%arg0: i32) -> (i32, i32) {
    %c0_i32 = arith.constant 0 : i32
    %c0_i32_0 = arith.constant 0 : i32
    %c0_i32_1 = arith.constant 0 : i32
    return %c0_i32, %c0_i32_0 : i32, i32
  }
  func.func @transform_12(%arg0: i32) -> i32 {
    %c0_i32 = arith.constant 0 : i32
    %c0_i32_0 = arith.constant 0 : i32
    return %c0_i32 : i32
  }
  func.func @transform_13(%arg0: i32) -> (i32, i32, i32) {
    %c0_i32 = arith.constant 0 : i32
    %c0_i32_0 = arith.constant 0 : i32
    %c0_i32_1 = arith.constant 0 : i32
    return %arg0, %c0_i32, %c0_i32_0 : i32, i32, i32
  }
}

</mosaic_0001>

<bundles_post_ra>
// kernel: tpu_custom_call.1
= control target key start
LH: loop header
LB: loop body
LE: loop exit
PB: predicated region body
PF: predicated region fallthrough
CT: control target
= control target key end

     0   :  { %s6431_s0 = inlined_call_operand.vmem [shape: f32[512,40], index: 0, kind: input, shape index: {}]   ;;  %s6432_s1 = inlined_call_operand.vmem [shape: f32[40,64], index: 1, kind: input, shape index: {}]   ;;  %s6433_s2 = inlined_call_operand.vmem [shape: f32[1,64], index: 2, kind: input, shape index: {}]   ;;  %s6434_s3 = inlined_call_operand.vmem [shape: f32[1,64], index: 3, kind: input, shape index: {}]   ;;  %s6435_s4 = inlined_call_operand.vmem [shape: f32[1,64], index: 4, kind: input, shape index: {}]   ;;  %s6436_s5 = inlined_call_operand.vmem [shape: f32[64,32], index: 5, kind: input, shape index: {}]   ;;  %s6437_s6 = inlined_call_operand.vmem [shape: f32[1,32], index: 6, kind: input, shape index: {}]   ;;  %s6438_s7 = inlined_call_operand.vmem [shape: f32[1,32], index: 7, kind: input, shape index: {}]   ;;  %s6439_s8 = inlined_call_operand.vmem [shape: f32[1,32], index: 8, kind: input, shape index: {}]   ;;  %s6440_s9 = inlined_call_operand.vmem [shape: f32[1,32], index: 9, kind: input, shape index: {}]   ;;  %s6441_s10 = inlined_call_operand.vmem [shape: f32[64,64], index: 10, kind: input, shape index: {}]   ;;  %s6442_s11 = inlined_call_operand.vmem [shape: f32[32,32], index: 11, kind: input, shape index: {}]   ;;  %s6443_s12 = inlined_call_operand.<no memory space> [shape: f32[1], index: 12, kind: input, shape index: {}]   ;;  %s6444_s13 = inlined_call_operand.hbm [shape: f32[2,1,256], index: 13, kind: output, shape index: {}]  }
   0x1   :  { %18 = sst [smem:[#allocation2]] %s6443_s12 }
   0x2   :  { %19 = vsyncpa [#allocation4], 0 }
   0x3   :  { %21 = vsyncpa [#allocation4 + $0x1], 0  ;;  %s4804_s27 = smov 0   ;;  %s4806_s28 = smov 0  }
   0x4   :  { %s4808_s29 = smov 0   ;;  %s4810_s30 = smov 0  }
   0x5 LB: > { %6467 = sst [smem:[#allocation6_spill]] %s4723_s29  ;;  %s3507_s12 = sadd.s32 4294967295, %s4727_s30   ;;  %s4727_s30 = sphi %s4810_s30, %s6564_s30   ;;  %s4723_s29 = sphi %s4808_s29, %s6563_s29   ;;  %s4719_s28 = sphi %s4806_s28, %s6562_s28   ;;  %s4715_s27 = sphi %s4804_s27, %s6561_s27  }
   0x6   : > { %s3508_s14 = sadd.s32 4294967294, %s4727_s30   ;;  %s4827_s15 = sadd.s32 1, %s4727_s30  }
   0x7   : > { %s312_s16 = sadd.s32 1, %s4723_s29  ;;  %s309_s17 = ssub.s32 %s4727_s30, %s4827_s15 }
   0x8   : > { %p322_p0 = scmp.ne.s32.totalorder %s4723_s29, %s4719_s28  ;;  %p310_p1 = scmp.eq.s32.totalorder %s309_s17, 0 }
   0x9   : > { %p323_p2 = scmp.eq.s32.totalorder %s3507_s12, 1  ;;  %p328_p3 = scmp.ne.s32.totalorder %s4719_s28, %s4715_s27 }
   0xa   : > { %p329_p4 = scmp.eq.s32.totalorder %s3508_s14, 1  ;;  %p3511_p7 = scmp.ge.s32.totalorder %s4727_s30, 1 }
   0xb   : > { %s4837_s18 = scalar_select %p310_p1, %s4723_s29, %s312_s16  }
   0xc   : > { %p4839_p5 = por %p323_p2, %p322_p0  ;;  %p4843_p6 = por %p329_p4, %p328_p3 }
   0xd   : > { %6468 = sst [smem:[#allocation7_spill]] %s4837_s18  ;;  %p392_p8 = scmp.lt.s32.totalorder %s4727_s30, 3 }
   0xf   : > { %p393_p9 = pnand %p3511_p7, %p392_p8 }
  0x11   : > { %396 = sbr.rel (%p393_p9) target bundleno = 1313 (0x521), region = 72 }
  0x18   : > { %v474_v0 = vld [vmem:[%s6432_s1] sm:$0xff]  ;;  %v475_v1 = vld [vmem:[%s6432_s1 + $0x8] sm:$0xff]  ;;  %v476_v2 = vld [vmem:[%s6432_s1 + $0x10] sm:$0xff]  ;;  %s4858_s14 = sshll.u32 %s3507_s12, 5  ;;  %vm486_vm0 = vcmask 326656   ;;  %vm816_vm1 = vcmask 523264  }
  0x19   : > { %v4377_v3 = vpack.c.bf16 %v475_v1, %v474_v0  ;;  %v477_v4 = vld [vmem:[%s6432_s1 + $0x18] sm:$0xff]  ;;  %p437_p10 = scmp.lt.s32.totalorder %s4858_s14, 63  ;;  %v808_v5 = vld [vmem:[%s6441_s10] sm:$0xff]  ;;  %v809_v7 = vld [vmem:[%s6441_s10 + $0x8] sm:$0xff]  ;;  %vm2197_vm2 = vcmask 261120   ;;  %s3239_s26 = sld [smem:[#allocation2]] }
  0x1a   : > { %v4381_v6 = vpack.c.bf16 %v477_v4, %v476_v2  ;;  %v810_v8 = vld [vmem:[%s6441_s10 + $0x10] sm:$0xff]  ;;  %v811_v9 = vld [vmem:[%s6441_s10 + $0x18] sm:$0xff]  ;;  %v4385_v10 = vpack.c.bf16 %v809_v7, %v808_v5  ;;  %v812_v12 = vld [vmem:[%s6441_s10 + $0x20] sm:$0xff]  ;;  %s4730_s12 = smov [#allocation3]  }
  0x1b   : > { %4378 = vmatprep.subr.bf16.mxu0 %v4377_v3  ;;  %s438_s16 = scalar_select %p437_p10, %s4858_s14, 63  ;;  %v4389_v11 = vpack.c.bf16 %v811_v9, %v810_v8  ;;  %v813_v13 = vld [vmem:[%s6441_s10 + $0x28] sm:$0xff]  ;;  %v478_v14 = vld [vmem:[%s6432_s1 + $0x20] sm:$0xff]  ;;  %v814_v17 = vld [vmem:[%s6441_s10 + $0x30] sm:$0xff] }
  0x1c   : > { %4380 = vmatpush3.bf16.msra.mxu0 %v4377_v3  ;;  %4386 = vmatprep.subr.bf16.mxu1 %v4385_v10  ;;  %v4393_v16 = vpack.c.bf16 %v813_v13, %v812_v12  ;;  %v815_v18 = vld [vmem:[%s6441_s10 + $0x38] sm:$0xff]  ;;  %v1857_v51 = vld [vmem:[%s6436_s5] sm:$0xff]  ;;  %v1858_v52 = vld [vmem:[%s6436_s5 + $0x8] sm:$0xff] }
  0x1d   : > { %4382 = vmatprep.subr.bf16.mxu0 %v4381_v6  ;;  %s3514_s24 = sshll.u32 %s438_s16, 3  ;;  %4388 = vmatpush3.bf16.msra.mxu1 %v4385_v10  ;;  %v4397_v21 = vpack.c.bf16 %v815_v18, %v814_v17  ;;  %v4417_v53 = vpack.c.bf16 %v1858_v52, %v1857_v51  ;;  %v4970_v54 = vld [vmem:[%s6433_s2] ss:$0 sm:$0xff]  ;;  %v1859_v56 = vld [vmem:[%s6436_s5 + $0x10] sm:$0xff]  ;;  %v1860_v57 = vld [vmem:[%s6436_s5 + $0x18] sm:$0xff]  ;;  %s433_s16 = sand.u32 1, %s4719_s28  }
  0x1e   : > { %s4889_s29 = scalar_lea.vmem %s6431_s0, %s3514_s24  ;;  %4390 = vmatprep.subr.bf16.mxu1 %v4389_v11  ;;  %v4421_v61 = vpack.c.bf16 %v1860_v57, %v1859_v56  ;;  %vm6272_vm3 = vmpackc.low %vm2197_vm2, %vm2197_vm2  ;;  %s6389_s24 = scalar_lea.hbm %s6444_s13, %s4858_s14 }
  0x1f   : > { %v442_v15 = vld [vmem:[%s4889_s29] sm:$0xff]  ;;  %v443_v19 = vld [vmem:[%s4889_s29 + $0x8] sm:$0xff]  ;;  %v444_v20 = vld [vmem:[%s4889_s29 + $0x10] sm:$0xff]  ;;  %s3435_s25 = scalar_lea.sflag [#allocation4], %s433_s16 }
  0x20   : > { %4384 = vmatpush3.bf16.msra.mxu0 %v4381_v6  ;;  %4025 = vmatprep.mubr.msk.f32.mxu0 %vm486_vm0, %v442_v15  ;;  %v445_v22 = vld [vmem:[%s4889_s29 + $0x18] sm:$0xff]  ;;  %v446_v23 = vld [vmem:[%s4889_s29 + $0x20] sm:$0xff]  ;;  %v447_v24 = vld [vmem:[%s4889_s29 + $0x28] sm:$0xff] }
  0x21   : > { %4023 = vmatprep.subr.mxu0 %v478_v14  ;;  %4392 = vmatpush3.bf16.msra.mxu1 %v4389_v11  ;;  %v448_v25 = vld [vmem:[%s4889_s29 + $0x30] sm:$0xff]  ;;  %v449_v26 = vld [vmem:[%s4889_s29 + $0x38] sm:$0xff]  ;;  %v450_v27 = vld [vmem:[%s4889_s29 + $0x40] sm:$0xff] }
  0x22   : > { %4394 = vmatprep.subr.bf16.mxu1 %v4393_v16  ;;  %v451_v28 = vld [vmem:[%s4889_s29 + $0x48] sm:$0xff]  ;;  %v452_v29 = vld [vmem:[%s4889_s29 + $0x50] sm:$0xff]  ;;  %v453_v30 = vld [vmem:[%s4889_s29 + $0x58] sm:$0xff] }
  0x23   : > { %v454_v31 = vld [vmem:[%s4889_s29 + $0x60] sm:$0xff]  ;;  %v455_v32 = vld [vmem:[%s4889_s29 + $0x68] sm:$0xff]  ;;  %v456_v33 = vld [vmem:[%s4889_s29 + $0x70] sm:$0xff] }
  0x24   : > { %4024 = vmatpush3.msra.mxu0 %v478_v14  ;;  %v457_v34 = vld [vmem:[%s4889_s29 + $0x78] sm:$0xff]  ;;  %v458_v35 = vld [vmem:[%s4889_s29 + $0x80] sm:$0xff]  ;;  %v459_v36 = vld [vmem:[%s4889_s29 + $0x88] sm:$0xff] }
  0x25   : > { %4026 = vmatmul.mubr.msk.f32.vlgmr.msra.gmra.mrb[0].mxu0 %vm486_vm0, %v443_v19  ;;  %4402 = vmatprep.subr.bf16.mxu0 %v4385_v10  ;;  %v460_v37 = vld [vmem:[%s4889_s29 + $0x90] sm:$0xff]  ;;  %v461_v38 = vld [vmem:[%s4889_s29 + $0x98] sm:$0xff]  ;;  %v462_v39 = vld [vmem:[%s4889_s29 + $0xa0] sm:$0xff] }
  0x26   : > { %4028 = vmatprep.mubr.msk.f32.mxu0 %vm486_vm0, %v444_v20  ;;  %4404 = vmatpush3.bf16.msra.mxu0 %v4385_v10  ;;  %v463_v40 = vld [vmem:[%s4889_s29 + $0xa8] sm:$0xff]  ;;  %v464_v41 = vld [vmem:[%s4889_s29 + $0xb0] sm:$0xff]  ;;  %v465_v42 = vld [vmem:[%s4889_s29 + $0xb8] sm:$0xff] }
  0x27   : > { %4406 = vmatprep.subr.bf16.mxu0 %v4389_v11  ;;  %4396 = vmatpush3.bf16.msra.mxu1 %v4393_v16  ;;  %v466_v43 = vld [vmem:[%s4889_s29 + $0xc0] sm:$0xff]  ;;  %v467_v44 = vld [vmem:[%s4889_s29 + $0xc8] sm:$0xff]  ;;  %v468_v45 = vld [vmem:[%s4889_s29 + $0xd0] sm:$0xff] }
  0x28   : > { %4398 = vmatprep.subr.bf16.mxu1 %v4397_v21  ;;  %v469_v46 = vld [vmem:[%s4889_s29 + $0xd8] sm:$0xff]  ;;  %v470_v47 = vld [vmem:[%s4889_s29 + $0xe0] sm:$0xff]  ;;  %v471_v48 = vld [vmem:[%s4889_s29 + $0xe8] sm:$0xff] }
  0x29   : > { %4029 = vmatmul.mubr.msk.f32.gmra.mrb[2].mxu0 %vm486_vm0, %v445_v22  ;;  %v472_v49 = vld [vmem:[%s4889_s29 + $0xf0] sm:$0xff]  ;;  %v473_v50 = vld [vmem:[%s4889_s29 + $0xf8] sm:$0xff]  ;;  %s3512_s29 = sshll.u32 %s433_s16, 1 }
  0x2a   : > { %4031 = vmatprep.mubr.msk.f32.mxu0 %vm486_vm0, %v446_v23  ;;  %4408 = vmatpush3.bf16.msra.mxu0 %v4389_v11  ;;  %s435_s17 = scalar_lea.vmem [#allocation3], %s3512_s29 }
  0x2b   : > { %4410 = vmatprep.subr.bf16.mxu0 %v4393_v16  ;;  %4400 = vmatpush3.bf16.msra.mxu1 %v4397_v21  ;;  %s3449_s21 = sshll.u32 %s435_s17, 4  ;;  %s6391_s21 = int_to_ptr.vmem [resolvable:$true] %s3449_s21 }
  0x2c   : > { %4418 = vmatprep.subr.bf16.mxu1 %v4417_v53  ;;  %s4665_s18 = scalar_lea.vmem %s6391_s21, 32 }
  0x2d   : > { %4032 = vmatmul.mubr.msk.f32.gmra.mrb[4].mxu0 %vm486_vm0, %v447_v24  ;;  %p4666_p11 = scmp.ne.s32.totalorder %s6391_s21, %s4665_s18 }
  0x2e   : > { %4034 = vmatprep.mubr.msk.f32.mxu0 %vm486_vm0, %v448_v25  ;;  %4412 = vmatpush3.bf16.msra.mxu0 %v4393_v16 }
  0x2f   : > { %4414 = vmatprep.subr.bf16.mxu0 %v4397_v21  ;;  %p4667_p12 = pnand %p4666_p11, %p4839_p5 }
  0x31   : > { %4035 = vmatmul.mubr.msk.f32.gmra.mrb[6].mxu0 %vm486_vm0, %v449_v26  ;;  %p4668_p13 = pneg %p4667_p12 }
  0x32   : > { %4037 = vmatprep.mubr.msk.f32.mxu0 %vm486_vm0, %v450_v27  ;;  %4416 = vmatpush3.bf16.msra.mxu0 %v4397_v21 }
  0x35   : > { %4038 = vmatmul.mubr.msk.f32.gmra.mrb[8].mxu0 %vm486_vm0, %v451_v28 }
  0x36   : > { %4040 = vmatprep.mubr.msk.f32.mxu0 %vm486_vm0, %v452_v29 }
  0x39   : > { %4041 = vmatmul.mubr.msk.f32.gmra.mrb[10].mxu0 %vm486_vm0, %v453_v30 }
  0x3a   : > { %4043 = vmatprep.mubr.msk.f32.mxu0 %vm486_vm0, %v454_v31 }
  0x3d   : > { %4044 = vmatmul.mubr.msk.f32.gmra.mrb[12].mxu0 %vm486_vm0, %v455_v32 }
  0x3e   : > { %4046 = vmatprep.mubr.msk.f32.mxu0 %vm486_vm0, %v456_v33 }
  0x41   : > { %4047 = vmatmul.mubr.msk.f32.gmra.mrb[14].mxu0 %vm486_vm0, %v457_v34 }
  0x42   : > { %4049 = vmatprep.mubr.msk.f32.mxu0 %vm486_vm0, %v458_v35 }
  0x45   : > { %4050 = vmatmul.mubr.msk.f32.gmra.mrb[16].mxu0 %vm486_vm0, %v459_v36 }
  0x46   : > { %4052 = vmatprep.mubr.msk.f32.mxu0 %vm486_vm0, %v460_v37 }
  0x49   : > { %4053 = vmatmul.mubr.msk.f32.gmra.mrb[18].mxu0 %vm486_vm0, %v461_v38 }
  0x4a   : > { %4055 = vmatprep.mubr.msk.f32.mxu0 %vm486_vm0, %v462_v39 }
  0x4d   : > { %4056 = vmatmul.mubr.msk.f32.gmra.mrb[20].mxu0 %vm486_vm0, %v463_v40 }
  0x4e   : > { %4058 = vmatprep.mubr.msk.f32.mxu0 %vm486_vm0, %v464_v41 }
  0x51   : > { %4059 = vmatmul.mubr.msk.f32.gmra.mrb[22].mxu0 %vm486_vm0, %v465_v42 }
  0x52   : > { %4061 = vmatprep.mubr.msk.f32.mxu0 %vm486_vm0, %v466_v43 }
  0x55   : > { %4062 = vmatmul.mubr.msk.f32.gmra.mrb[24].mxu0 %vm486_vm0, %v467_v44 }
  0x56   : > { %4064 = vmatprep.mubr.msk.f32.mxu0 %vm486_vm0, %v468_v45 }
  0x59   : > { %4065 = vmatmul.mubr.msk.f32.gmra.mrb[26].mxu0 %vm486_vm0, %v469_v46 }
  0x5a   : > { %4067 = vmatprep.mubr.msk.f32.mxu0 %vm486_vm0, %v470_v47 }
  0x5d   : > { %4068 = vmatmul.mubr.msk.f32.gmra.mrb[28].mxu0 %vm486_vm0, %v471_v48 }
  0x5e   : > { %4070 = vmatprep.mubr.msk.f32.mxu0 %vm486_vm0, %v472_v49 }
  0x61   : > { %4071 = vmatmul.mubr.msk.f32.gmra.mrb[30].mxu0 %vm486_vm0, %v473_v50 }
  0xf8   : > { %v4027_v55 = vpop.f32.mrb[0].mxu0 }
  0xf9   : > { %v4979_v58 = vadd.f32 %v4027_v55, %v4970_v54  ;;  %v649_v59 = vpop.f32.mrb[1].mxu0 }
  0xfa   : > { %v4982_v60 = vadd.f32 %v4970_v54, %v649_v59 }
  0xfb   : > { %v1139_v0 = vmul.f32 %v4979_v58, %v4979_v58 }
  0xfc   : > { %v1138_v62 = vmul.f32 %v4982_v60, %v4982_v60  ;;  %v4030_v63 = vpop.f32.mrb[2].mxu0  ;;  %4089 = vmatprep.mubr.msk.f32.mxu1 %vm816_vm1, %v4982_v60 }
  0xfd   : > { %v4991_v1 = vadd.f32 %v4030_v63, %v4970_v54  ;;  %v659_v2 = vpop.f32.mrb[3].mxu0  ;;  %4090 = vmatmul.mubr.msk.f32.vlgmr.msra.gmra.mrb[0].mxu1 %vm816_vm1, %v4979_v58 }
  0xfe   : > { %v4996_v3 = vadd.f32 %v4970_v54, %v659_v2  ;;  %4153 = vmatprep.mubr.msk.f32.mxu0 %vm816_vm1, %v1138_v62  ;;  %4420 = vmatpush3.bf16.msra.mxu1 %v4417_v53 }
  0xff   : > { %4154 = vmatmul.mubr.msk.f32.vlgmr.msra.gmra.mrb[32].mxu0 %vm816_vm1, %v1139_v0  ;;  %4422 = vmatprep.subr.bf16.mxu1 %v4421_v61  ;;  %v1141_v6 = vmul.f32 %v4991_v1, %v4991_v1 }
 0x100   : > { %v1140_v4 = vmul.f32 %v4996_v3, %v4996_v3  ;;  %v4033_v5 = vpop.f32.mrb[4].mxu0  ;;  %4092 = vmatprep.mubr.msk.f32.mxu1 %vm816_vm1, %v4996_v3 }
 0x101   : > { %v5007_v7 = vadd.f32 %v4033_v5, %v4970_v54  ;;  %v669_v8 = vpop.f32.mrb[5].mxu0  ;;  %4093 = vmatmul.mubr.msk.f32.gmra.mrb[2].mxu1 %vm816_vm1, %v4991_v1 }
 0x102   : > { %v5012_v9 = vadd.f32 %v4970_v54, %v669_v8  ;;  %4156 = vmatprep.mubr.msk.f32.mxu0 %vm816_vm1, %v1140_v4  ;;  %4424 = vmatpush3.bf16.msra.mxu1 %v4421_v61 }
 0x103   : > { %4157 = vmatmul.mubr.msk.f32.gmra.mrb[34].mxu0 %vm816_vm1, %v1141_v6  ;;  %v1143_v12 = vmul.f32 %v5007_v7, %v5007_v7 }
 0x104   : > { %v1142_v10 = vmul.f32 %v5012_v9, %v5012_v9  ;;  %v4036_v11 = vpop.f32.mrb[6].mxu0  ;;  %4095 = vmatprep.mubr.msk.f32.mxu1 %vm816_vm1, %v5012_v9 }
 0x105   : > { %v5023_v13 = vadd.f32 %v4036_v11, %v4970_v54  ;;  %v679_v14 = vpop.f32.mrb[7].mxu0  ;;  %4096 = vmatmul.mubr.msk.f32.gmra.mrb[4].mxu1 %vm816_vm1, %v5007_v7 }
 0x106   : > { %v5028_v15 = vadd.f32 %v4970_v54, %v679_v14  ;;  %4159 = vmatprep.mubr.msk.f32.mxu0 %vm816_vm1, %v1142_v10 }
 0x107   : > { %4160 = vmatmul.mubr.msk.f32.gmra.mrb[36].mxu0 %vm816_vm1, %v1143_v12  ;;  %v1145_v18 = vmul.f32 %v5023_v13, %v5023_v13 }
 0x108   : > { %v1144_v16 = vmul.f32 %v5028_v15, %v5028_v15  ;;  %v4039_v17 = vpop.f32.mrb[8].mxu0  ;;  %4098 = vmatprep.mubr.msk.f32.mxu1 %vm816_vm1, %v5028_v15 }
 0x109   : > { %v5039_v19 = vadd.f32 %v4039_v17, %v4970_v54  ;;  %v689_v20 = vpop.f32.mrb[9].mxu0  ;;  %4099 = vmatmul.mubr.msk.f32.gmra.mrb[6].mxu1 %vm816_vm1, %v5023_v13 }
 0x10a   : > { %v5044_v21 = vadd.f32 %v4970_v54, %v689_v20  ;;  %4162 = vmatprep.mubr.msk.f32.mxu0 %vm816_vm1, %v1144_v16 }
 0x10b   : > { %4163 = vmatmul.mubr.msk.f32.gmra.mrb[38].mxu0 %vm816_vm1, %v1145_v18  ;;  %v1147_v24 = vmul.f32 %v5039_v19, %v5039_v19 }
 0x10c   : > { %v1146_v22 = vmul.f32 %v5044_v21, %v5044_v21  ;;  %v4042_v23 = vpop.f32.mrb[10].mxu0  ;;  %4101 = vmatprep.mubr.msk.f32.mxu1 %vm816_vm1, %v5044_v21 }
 0x10d   : > { %v5055_v25 = vadd.f32 %v4042_v23, %v4970_v54  ;;  %v699_v26 = vpop.f32.mrb[11].mxu0  ;;  %4102 = vmatmul.mubr.msk.f32.gmra.mrb[8].mxu1 %vm816_vm1, %v5039_v19 }
 0x10e   : > { %v5060_v27 = vadd.f32 %v4970_v54, %v699_v26  ;;  %4165 = vmatprep.mubr.msk.f32.mxu0 %vm816_vm1, %v1146_v22 }
 0x10f   : > { %6471 = vst [vmem:[#allocation8_spill] sm:$0xff] %v5055_v25  ;;  %4166 = vmatmul.mubr.msk.f32.gmra.mrb[40].mxu0 %vm816_vm1, %v1147_v24  ;;  %v1149_v30 = vmul.f32 %v5055_v25, %v5055_v25 }
 0x110   : > { %v1148_v28 = vmul.f32 %v5060_v27, %v5060_v27  ;;  %v4045_v29 = vpop.f32.mrb[12].mxu0  ;;  %4104 = vmatprep.mubr.msk.f32.mxu1 %vm816_vm1, %v5060_v27 }
 0x111   : > { %v5071_v31 = vadd.f32 %v4045_v29, %v4970_v54  ;;  %v709_v32 = vpop.f32.mrb[13].mxu0  ;;  %4105 = vmatmul.mubr.msk.f32.gmra.mrb[10].mxu1 %vm816_vm1, %v5055_v25 }
 0x112   : > { %v5076_v33 = vadd.f32 %v4970_v54, %v709_v32  ;;  %4168 = vmatprep.mubr.msk.f32.mxu0 %vm816_vm1, %v1148_v28 }
 0x113   : > { %6472 = vst [vmem:[#allocation9_spill] sm:$0xff] %v5071_v31  ;;  %4169 = vmatmul.mubr.msk.f32.gmra.mrb[42].mxu0 %vm816_vm1, %v1149_v30  ;;  %v1151_v36 = vmul.f32 %v5071_v31, %v5071_v31 }
 0x114   : > { %v1150_v34 = vmul.f32 %v5076_v33, %v5076_v33  ;;  %v4048_v35 = vpop.f32.mrb[14].mxu0  ;;  %4107 = vmatprep.mubr.msk.f32.mxu1 %vm816_vm1, %v5076_v33 }
 0x115   : > { %v5087_v37 = vadd.f32 %v4048_v35, %v4970_v54  ;;  %v719_v38 = vpop.f32.mrb[15].mxu0  ;;  %4108 = vmatmul.mubr.msk.f32.gmra.mrb[12].mxu1 %vm816_vm1, %v5071_v31 }
 0x116   : > { %v5092_v39 = vadd.f32 %v4970_v54, %v719_v38  ;;  %4171 = vmatprep.mubr.msk.f32.mxu0 %vm816_vm1, %v1150_v34 }
 0x117   : > { %4172 = vmatmul.mubr.msk.f32.gmra.mrb[44].mxu0 %vm816_vm1, %v1151_v36  ;;  %v1153_v42 = vmul.f32 %v5087_v37, %v5087_v37 }
 0x118   : > { %v1152_v40 = vmul.f32 %v5092_v39, %v5092_v39  ;;  %v4051_v41 = vpop.f32.mrb[16].mxu0  ;;  %4110 = vmatprep.mubr.msk.f32.mxu1 %vm816_vm1, %v5092_v39 }
 0x119   : > { %v5103_v43 = vadd.f32 %v4051_v41, %v4970_v54  ;;  %v729_v44 = vpop.f32.mrb[17].mxu0  ;;  %4111 = vmatmul.mubr.msk.f32.gmra.mrb[14].mxu1 %vm816_vm1, %v5087_v37 }
 0x11a   : > { %v5108_v45 = vadd.f32 %v4970_v54, %v729_v44  ;;  %4174 = vmatprep.mubr.msk.f32.mxu0 %vm816_vm1, %v1152_v40  ;;  %v1862_v44 = vld [vmem:[%s6436_s5 + $0x28] sm:$0xff] }
 0x11b   : > { %4175 = vmatmul.mubr.msk.f32.gmra.mrb[46].mxu0 %vm816_vm1, %v1153_v42  ;;  %v1155_v48 = vmul.f32 %v5103_v43, %v5103_v43 }
 0x11c   : > { %v1154_v46 = vmul.f32 %v5108_v45, %v5108_v45  ;;  %v4054_v47 = vpop.f32.mrb[18].mxu0  ;;  %4113 = vmatprep.mubr.msk.f32.mxu1 %vm816_vm1, %v5108_v45 }
 0x11d   : > { %v5119_v49 = vadd.f32 %v4054_v47, %v4970_v54  ;;  %v739_v50 = vpop.f32.mrb[19].mxu0  ;;  %4114 = vmatmul.mubr.msk.f32.gmra.mrb[16].mxu1 %vm816_vm1, %v5103_v43  ;;  %v1863_v47 = vld [vmem:[%s6436_s5 + $0x30] sm:$0xff] }
 0x11e   : > { %v5124_v51 = vadd.f32 %v4970_v54, %v739_v50  ;;  %4177 = vmatprep.mubr.msk.f32.mxu0 %vm816_vm1, %v1154_v46 }
 0x11f   : > { %v1157_v52 = vmul.f32 %v5119_v49, %v5119_v49  ;;  %4178 = vmatmul.mubr.msk.f32.gmra.mrb[48].mxu0 %vm816_vm1, %v1155_v48  ;;  %v1864_v48 = vld [vmem:[%s6436_s5 + $0x38] sm:$0xff] }
 0x120   : > { %v1156_v53 = vmul.f32 %v5124_v51, %v5124_v51  ;;  %v4057_v55 = vpop.f32.mrb[20].mxu0  ;;  %4116 = vmatprep.mubr.msk.f32.mxu1 %vm816_vm1, %v5124_v51  ;;  %v4429_v50 = vpack.c.bf16 %v1864_v48, %v1863_v47 }
 0x121   : > { %v5135_v56 = vadd.f32 %v4057_v55, %v4970_v54  ;;  %v749_v57 = vpop.f32.mrb[21].mxu0  ;;  %4117 = vmatmul.mubr.msk.f32.gmra.mrb[18].mxu1 %vm816_vm1, %v5119_v49  ;;  %v2195_v55 = vld [vmem:[%s6442_s11 + $0x10] sm:$0xff] }
 0x122   : > { %v5140_v59 = vadd.f32 %v4970_v54, %v749_v57  ;;  %4180 = vmatprep.mubr.msk.f32.mxu0 %vm816_vm1, %v1156_v53  ;;  %v2194_v53 = vld [vmem:[%s6442_s11 + $0x8] sm:$0xff] }
 0x123   : > { %v1159_v61 = vmul.f32 %v5135_v56, %v5135_v56  ;;  %4181 = vmatmul.mubr.msk.f32.gmra.mrb[50].mxu0 %vm816_vm1, %v1157_v52  ;;  %v2193_v52 = vld [vmem:[%s6442_s11] sm:$0xff] }
 0x124   : > { %v1158_v62 = vmul.f32 %v5140_v59, %v5140_v59  ;;  %v4060_v63 = vpop.f32.mrb[22].mxu0  ;;  %4119 = vmatprep.mubr.msk.f32.mxu1 %vm816_vm1, %v5140_v59  ;;  %v5255_v57 = vpack.c.bf16 %v2194_v53, %v2193_v52 }
 0x125   : > { %v5151_v0 = vadd.f32 %v4060_v63, %v4970_v54  ;;  %v759_v2 = vpop.f32.mrb[23].mxu0  ;;  %4120 = vmatmul.mubr.msk.f32.gmra.mrb[20].mxu1 %vm816_vm1, %v5135_v56 }
 0x126   : > { %v5156_v4 = vadd.f32 %v4970_v54, %v759_v2  ;;  %4183 = vmatprep.mubr.msk.f32.mxu0 %vm816_vm1, %v1158_v62  ;;  %4434 = vmatprep.subr.bf16.mxu0 %v5255_v57 }
 0x127   : > { %v1161_v5 = vmul.f32 %v5151_v0, %v5151_v0  ;;  %4184 = vmatmul.mubr.msk.f32.gmra.mrb[52].mxu0 %vm816_vm1, %v1159_v61  ;;  %v2196_v61 = vld [vmem:[%s6442_s11 + $0x18] sm:$0xff] }
 0x128   : > { %v1160_v6 = vmul.f32 %v5156_v4, %v5156_v4  ;;  %v4063_v8 = vpop.f32.mrb[24].mxu0  ;;  %4122 = vmatprep.mubr.msk.f32.mxu1 %vm816_vm1, %v5156_v4  ;;  %v5260_v62 = vpack.c.bf16 %v2196_v61, %v2195_v55  ;;  %4436 = vmatpush3.bf16.msra.mxu0 %v5255_v57 }
 0x129   : > { %v5167_v10 = vadd.f32 %v4063_v8, %v4970_v54  ;;  %v769_v11 = vpop.f32.mrb[25].mxu0  ;;  %4123 = vmatmul.mubr.msk.f32.gmra.mrb[22].mxu1 %vm816_vm1, %v5151_v0 }
 0x12a   : > { %v5172_v12 = vadd.f32 %v4970_v54, %v769_v11  ;;  %4186 = vmatprep.mubr.msk.f32.mxu0 %vm816_vm1, %v1160_v6  ;;  %4438 = vmatprep.subr.bf16.mxu0 %v5260_v62 }
 0x12b   : > { %6473 = vst [vmem:[#allocation10_spill] sm:$0xff] %v5167_v10  ;;  %v1163_v14 = vmul.f32 %v5167_v10, %v5167_v10  ;;  %4187 = vmatmul.mubr.msk.f32.gmra.mrb[54].mxu0 %vm816_vm1, %v1161_v5 }
 0x12c   : > { %6474 = vst [vmem:[#allocation11_spill] sm:$0xff] %v5172_v12  ;;  %v1162_v16 = vmul.f32 %v5172_v12, %v5172_v12  ;;  %v4066_v17 = vpop.f32.mrb[26].mxu0  ;;  %4125 = vmatprep.mubr.msk.f32.mxu1 %vm816_vm1, %v5172_v12  ;;  %4440 = vmatpush3.bf16.msra.mxu0 %v5260_v62 }
 0x12d   : > { %v5183_v18 = vadd.f32 %v4066_v17, %v4970_v54  ;;  %v779_v20 = vpop.f32.mrb[27].mxu0  ;;  %4126 = vmatmul.mubr.msk.f32.gmra.mrb[24].mxu1 %vm816_vm1, %v5167_v10 }
 0x12e   : > { %v5188_v22 = vadd.f32 %v4970_v54, %v779_v20  ;;  %4189 = vmatprep.mubr.msk.f32.mxu0 %vm816_vm1, %v1162_v16 }
 0x12f   : > { %6475 = vst [vmem:[#allocation12_spill] sm:$0xff] %v5183_v18  ;;  %v1165_v23 = vmul.f32 %v5183_v18, %v5183_v18  ;;  %4190 = vmatmul.mubr.msk.f32.gmra.mrb[56].mxu0 %vm816_vm1, %v1163_v14 }
 0x130   : > { %6476 = vst [vmem:[#allocation13_spill] sm:$0xff] %v5188_v22  ;;  %v1164_v24 = vmul.f32 %v5188_v22, %v5188_v22  ;;  %v4069_v26 = vpop.f32.mrb[28].mxu0  ;;  %4128 = vmatprep.mubr.msk.f32.mxu1 %vm816_vm1, %v5188_v22 }
 0x131   : > { %v5199_v28 = vadd.f32 %v4069_v26, %v4970_v54  ;;  %v789_v29 = vpop.f32.mrb[29].mxu0  ;;  %4129 = vmatmul.mubr.msk.f32.gmra.mrb[26].mxu1 %vm816_vm1, %v5183_v18 }
 0x132   : > { %v5204_v30 = vadd.f32 %v4970_v54, %v789_v29  ;;  %4192 = vmatprep.mubr.msk.f32.mxu0 %vm816_vm1, %v1164_v24 }
 0x133   : > { %6477 = vst [vmem:[#allocation14_spill] sm:$0xff] %v5199_v28  ;;  %v1167_v32 = vmul.f32 %v5199_v28, %v5199_v28  ;;  %4193 = vmatmul.mubr.msk.f32.gmra.mrb[58].mxu0 %vm816_vm1, %v1165_v23 }
 0x134   : > { %6478 = vst [vmem:[#allocation15_spill] sm:$0xff] %v5204_v30  ;;  %v1166_v34 = vmul.f32 %v5204_v30, %v5204_v30  ;;  %v4072_v35 = vpop.f32.mrb[30].mxu0  ;;  %4131 = vmatprep.mubr.msk.f32.mxu1 %vm816_vm1, %v5204_v30 }
 0x135   : > { %v5215_v36 = vadd.f32 %v4072_v35, %v4970_v54  ;;  %v799_v38 = vpop.f32.mrb[31].mxu0  ;;  %4132 = vmatmul.mubr.msk.f32.gmra.mrb[28].mxu1 %vm816_vm1, %v5199_v28 }
 0x136   : > { %v5220_v40 = vadd.f32 %v4970_v54, %v799_v38  ;;  %4195 = vmatprep.mubr.msk.f32.mxu0 %vm816_vm1, %v1166_v34  ;;  %v1861_v54 = vld [vmem:[%s6436_s5 + $0x20] sm:$0xff] }
 0x137   : > { %6479 = vst [vmem:[#allocation16_spill] sm:$0xff] %v5215_v36  ;;  %v1169_v41 = vmul.f32 %v5215_v36, %v5215_v36  ;;  %4196 = vmatmul.mubr.msk.f32.gmra.mrb[60].mxu0 %vm816_vm1, %v1167_v32  ;;  %v4425_v46 = vpack.c.bf16 %v1862_v44, %v1861_v54 }
 0x138   : > { %6480 = vst [vmem:[#allocation17_spill] sm:$0xff] %v5220_v40  ;;  %v1168_v42 = vmul.f32 %v5220_v40, %v5220_v40  ;;  %4134 = vmatprep.mubr.msk.f32.mxu1 %vm816_vm1, %v5220_v40 }
 0x139   : > { %4135 = vmatmul.mubr.msk.f32.gmra.mrb[30].mxu1 %vm816_vm1, %v5215_v36  ;;  %4426 = vmatprep.subr.bf16.mxu1 %v4425_v46 }
 0x13a   : > { %4198 = vmatprep.mubr.msk.f32.mxu0 %vm816_vm1, %v1168_v42  ;;  %4428 = vmatpush3.bf16.msra.mxu1 %v4425_v46 }
 0x13b   : > { %4199 = vmatmul.mubr.msk.f32.gmra.mrb[62].mxu0 %vm816_vm1, %v1169_v41  ;;  %4430 = vmatprep.subr.bf16.mxu1 %v4429_v50 }
 0x13e   : > { %4432 = vmatpush3.bf16.msra.mxu1 %v4429_v50 }
 0x13f   : > { %4442 = vmatprep.subr.bf16.mxu1 %v5255_v57 }
 0x1d0   : > { %v5267_v63 = vpop.f32.mrb[0].mxu1 }
 0x1d1   : > { %v1492_v2 = vmul.f32 %v5267_v63, %v5267_v63  ;;  %v5271_v5 = vpop.f32.mrb[1].mxu1 }
 0x1d2   : > { %v1491_v6 = vmul.f32 %v5271_v5, %v5271_v5  ;;  %v4155_v8 = vpop.f32.mrb[32].mxu0 }
 0x1d3   : > { %v1524_v11 = vsub.f32 %v4155_v8, %v1492_v2  ;;  %v1332_v14 = vpop.f32.mrb[33].mxu0 }
 0x1d4   : > { %v1523_v16 = vsub.f32 %v1332_v14, %v1491_v6  ;;  %v5275_v17 = vpop.f32.mrb[2].mxu1 }
 0x1d5   : > { %v1556_v20 = vmax.f32 %v1524_v11, 0.0  ;;  %v1494_v23 = vmul.f32 %v5275_v17, %v5275_v17  ;;  %v5279_v24 = vpop.f32.mrb[3].mxu1 }
 0x1d6   : > { %v1555_v26 = vmax.f32 %v1523_v16, 0.0  ;;  %v1493_v29 = vmul.f32 %v5279_v24, %v5279_v24  ;;  %v4158_v32 = vpop.f32.mrb[34].mxu0 }
 0x1d7   : > { %v1588_v34 = vadd.f32 1e-05, %v1556_v20  ;;  %v1526_v35 = vsub.f32 %v4158_v32, %v1494_v23  ;;  %v1342_v38 = vpop.f32.mrb[35].mxu0 }
 0x1d8   : > { %v1587_v41 = vadd.f32 1e-05, %v1555_v26  ;;  %v1525_v42 = vsub.f32 %v1342_v38, %v1493_v29  ;;  %v5283_v54 = vpop.f32.mrb[4].mxu1 }
 0x1d9   : > { %4537 = vrsqrt.f32 %v1588_v34  ;;  %v1558_v44 = vmax.f32 %v1526_v35, 0.0  ;;  %v1496_v46 = vmul.f32 %v5283_v54, %v5283_v54  ;;  %v5287_v47 = vpop.f32.mrb[5].mxu1 }
 0x1da   : > { %4539 = vrsqrt.f32 %v1587_v41  ;;  %v1557_v48 = vmax.f32 %v1525_v42, 0.0  ;;  %v1495_v50 = vmul.f32 %v5287_v47, %v5287_v47  ;;  %v4161_v52 = vpop.f32.mrb[36].mxu0  ;;  %v1652_v41 = vsub.f32 %v4979_v58, %v5267_v63  ;;  %v5306_v42 = vld [vmem:[%s6434_s3] ss:$0 sm:$0xff] }
 0x1db   : > { %v1590_v53 = vadd.f32 1e-05, %v1558_v44  ;;  %v1528_v55 = vsub.f32 %v4161_v52, %v1496_v46  ;;  %v1352_v61 = vpop.f32.mrb[37].mxu0  ;;  %v1651_v52 = vsub.f32 %v4982_v60, %v5271_v5 }
 0x1dc   : > { %v1589_v2 = vadd.f32 1e-05, %v1557_v48  ;;  %v1527_v6 = vsub.f32 %v1352_v61, %v1495_v50  ;;  %v5291_v8 = vpop.f32.mrb[6].mxu1 }
 0x1dd   : > { %v1560_v11 = vmax.f32 %v1528_v55, 0.0  ;;  %v1498_v14 = vmul.f32 %v5291_v8, %v5291_v8  ;;  %v5295_v16 = vpop.f32.mrb[7].mxu1  ;;  %4541 = vrsqrt.f32 %v1590_v53 }
 0x1de   : > { %v1559_v20 = vmax.f32 %v1527_v6, 0.0  ;;  %v1497_v23 = vmul.f32 %v5295_v16, %v5295_v16  ;;  %v4164_v26 = vpop.f32.mrb[38].mxu0  ;;  %4543 = vrsqrt.f32 %v1589_v2 }
 0x1df   : > { %v1592_v29 = vadd.f32 1e-05, %v1560_v11  ;;  %v1530_v32 = vsub.f32 %v4164_v26, %v1498_v14  ;;  %v1362_v34 = vpop.f32.mrb[39].mxu0 }
 0x1e0   : > { %v1529_v35 = vsub.f32 %v1362_v34, %v1497_v23  ;;  %v5299_v38 = vpop.f32.mrb[8].mxu1  ;;  %v1591_v44 = vadd.f32 1e-05, %v1559_v20 }
 0x1e1   : > { %v1562_v46 = vmax.f32 %v1530_v32, 0.0  ;;  %v1500_v48 = vmul.f32 %v5299_v38, %v5299_v38  ;;  %v5310_v50 = vpop.f32.mrb[9].mxu1  ;;  %4545 = vrsqrt.f32 %v1592_v29 }
 0x1e2   : > { %v1561_v53 = vmax.f32 %v1529_v35, 0.0  ;;  %v1499_v58 = vmul.f32 %v5310_v50, %v5310_v50  ;;  %v4167_v63 = vpop.f32.mrb[40].mxu0  ;;  %4547 = vrsqrt.f32 %v1591_v44 }
 0x1e3   : > { %v4538_v55 = vpop.eup %4537  ;;  %v1594_v6 = vadd.f32 1e-05, %v1562_v46  ;;  %v1532_v11 = vsub.f32 %v4167_v63, %v1500_v48  ;;  %v1372_v14 = vpop.f32.mrb[41].mxu0  ;;  %v5333_v63 = vld [vmem:[%s6435_s4] ss:$0 sm:$0xff] }
 0x1e4   : > { %v4540_v20 = vpop.eup %4539  ;;  %v1691_v23 = vmul.f32 %v4538_v55, %v5306_v42  ;;  %v1593_v5 = vadd.f32 1e-05, %v1561_v53  ;;  %v1531_v26 = vsub.f32 %v1372_v14, %v1499_v58  ;;  %v5323_v29 = vpop.f32.mrb[10].mxu1 }
 0x1e5   : > { %6481 = vst [vmem:[#allocation18_spill] sm:$0xff] %v5323_v29  ;;  %v1690_v32 = vmul.f32 %v4540_v20, %v5306_v42  ;;  %v1564_v34 = vmax.f32 %v1532_v11, 0.0  ;;  %v1502_v35 = vmul.f32 %v5323_v29, %v5323_v29  ;;  %v5328_v46 = vpop.f32.mrb[11].mxu1  ;;  %4549 = vrsqrt.f32 %v1594_v6 }
 0x1e6   : > { %v1723_v48 = vmul.f32 %v1691_v23, %v1652_v41  ;;  %v1563_v55 = vmax.f32 %v1531_v26, 0.0  ;;  %v4170_v44 = vpop.f32.mrb[42].mxu0  ;;  %v1501_v14 = vmul.f32 %v5328_v46, %v5328_v46  ;;  %4551 = vrsqrt.f32 %v1593_v5 }
 0x1e7   : > { %v1596_v11 = vadd.f32 1e-05, %v1564_v34  ;;  %v1534_v20 = vsub.f32 %v4170_v44, %v1502_v35  ;;  %v1382_v41 = vpop.f32.mrb[43].mxu0  ;;  %v4542_v23 = vpop.eup %4541  ;;  %v1722_v58 = vmul.f32 %v1690_v32, %v1651_v52 }
 0x1e8   : > { %v5345_v61 = vpop.f32.mrb[12].mxu1  ;;  %v4544_v26 = vpop.eup %4543  ;;  %v5348_v6 = vadd.f32 %v5333_v63, %v1723_v48  ;;  %v1595_v34 = vadd.f32 1e-05, %v1563_v55  ;;  %v1533_v40 = vsub.f32 %v1382_v41, %v1501_v14  ;;  %v5361_v48 = vmul.f32 %v4542_v23, %v5306_v42 }
 0x1e9   : > { %6482 = vst [vmem:[#allocation19_spill] sm:$0xff] %v5345_v61  ;;  %v1566_v2 = vmax.f32 %v1534_v20, 0.0  ;;  %v5350_v35 = vpop.f32.mrb[13].mxu1  ;;  %v1504_v52 = vmul.f32 %v5345_v61, %v5345_v61  ;;  %4553 = vrsqrt.f32 %v1596_v11  ;;  %v1692_v44 = vmul.f32 %v4544_v26, %v5306_v42 }
 0x1ea   : > { %6483 = vst [vmem:[#allocation20_spill] sm:$0xff] %v5350_v35  ;;  %v4173_v32 = vpop.f32.mrb[44].mxu0  ;;  %v1565_v55 = vmax.f32 %v1533_v40, 0.0  ;;  %v1503_v14 = vmul.f32 %v5350_v35, %v5350_v35  ;;  %v1761_v53 = vadd.f32 %v5333_v63, %v1722_v58  ;;  %v1794_v30 = vmul.f32 0.01, %v5348_v6 }
 0x1eb   : > { %v1392_v20 = vpop.f32.mrb[45].mxu0  ;;  %v4546_v41 = vpop.eup %4545  ;;  %v1598_v5 = vadd.f32 1e-05, %v1566_v2  ;;  %v1536_v60 = vsub.f32 %v4173_v32, %v1504_v52  ;;  %4555 = vrsqrt.f32 %v1595_v34 }
 0x1ec   : > { %v5366_v36 = vpop.f32.mrb[14].mxu1  ;;  %v1597_v23 = vadd.f32 1e-05, %v1565_v55  ;;  %v1535_v28 = vsub.f32 %v1392_v20, %v1503_v14  ;;  %v4548_v32 = vpop.eup %4547  ;;  %v5379_v58 = vmul.f32 %v4546_v41, %v5306_v42  ;;  %v1793_v20 = vmul.f32 0.01, %v1761_v53 }
 0x1ed   : > { %v5370_v11 = vpop.f32.mrb[15].mxu1  ;;  %v1568_v18 = vmax.f32 %v1536_v60, 0.0  ;;  %v1506_v26 = vmul.f32 %v5366_v36, %v5366_v36  ;;  %4557 = vrsqrt.f32 %v1598_v5 }
 0x1ee   : > { %v1505_v2 = vmul.f32 %v5370_v11, %v5370_v11  ;;  %v4176_v52 = vpop.f32.mrb[46].mxu0  ;;  %v1567_v55 = vmax.f32 %v1535_v28, 0.0  ;;  %4559 = vrsqrt.f32 %v1597_v23  ;;  %v1825_v10 = vmax.f32 %v1761_v53, %v1793_v20 }
 0x1ef   : > { %v1402_v14 = vpop.f32.mrb[47].mxu0  ;;  %v1600_v40 = vadd.f32 1e-05, %v1568_v18  ;;  %v1538_v60 = vsub.f32 %v4176_v52, %v1506_v26  ;;  %v4550_v31 = vpop.eup %4549  ;;  %v1694_v28 = vmul.f32 %v4548_v32, %v5306_v42  ;;  %v1826_v18 = vmax.f32 %v5348_v6, %v1794_v30 }
 0x1f0   : > { %v1537_v22 = vsub.f32 %v1402_v14, %v1505_v2  ;;  %v5383_v61 = vpop.f32.mrb[16].mxu1  ;;  %v1599_v12 = vadd.f32 1e-05, %v1567_v55  ;;  %v4552_v25 = vpop.eup %4551  ;;  %4217 = vmatprep.mubr.msk.f32.mxu1 %vm816_vm1, %v1825_v10 }
 0x1f1   : > { %v1508_v41 = vmul.f32 %v5383_v61, %v5383_v61  ;;  %v5387_v29 = vpop.f32.mrb[17].mxu1  ;;  %v1570_v34 = vmax.f32 %v1538_v60, 0.0  ;;  %4561 = vrsqrt.f32 %v1600_v40  ;;  %4218 = vmatmul.mubr.msk.f32.vlgmr.msra.gmra.mrb[32].mxu1 %vm816_vm1, %v1826_v18  ;;  %v1696_v60 = vmul.f32 %v4552_v25, %v5306_v42 }
 0x1f2   : > { %v1569_v35 = vmax.f32 %v1537_v22, 0.0  ;;  %v4179_v5 = vpop.f32.mrb[48].mxu0  ;;  %v1507_v53 = vmul.f32 %v5387_v29, %v5387_v29  ;;  %4563 = vrsqrt.f32 %v1599_v12  ;;  %v6484_v22 = vsub.f32 %v4996_v3, %v5279_v24  ;;  %4444 = vmatpush3.bf16.msra.mxu1 %v5255_v57 }
 0x1f3   : > { %v1540_v23 = vsub.f32 %v4179_v5, %v1508_v41  ;;  %v1412_v2 = vpop.f32.mrb[49].mxu0  ;;  %v1602_v32 = vadd.f32 1e-05, %v1570_v34  ;;  %v4554_v40 = vpop.eup %4553  ;;  %v5410_v34 = vmul.f32 %v4550_v31, %v5306_v42  ;;  %v6485_v24 = vsub.f32 %v4991_v1, %v5275_v17  ;;  %4446 = vmatprep.subr.bf16.mxu1 %v5260_v62 }
 0x1f4   : > { %v1724_v30 = vmul.f32 %v1692_v44, %v6484_v22  ;;  %v5402_v6 = vpop.f32.mrb[18].mxu1  ;;  %v1601_v10 = vadd.f32 1e-05, %v1569_v35  ;;  %v1539_v14 = vsub.f32 %v1412_v2, %v1507_v53  ;;  %v5424_v5 = vmul.f32 %v4554_v40, %v5306_v42 }
 0x1f5   : > { %v1572_v55 = vmax.f32 %v1540_v23, 0.0  ;;  %v1510_v20 = vmul.f32 %v5402_v6, %v5402_v6  ;;  %v5406_v12 = vpop.f32.mrb[19].mxu1  ;;  %v1725_v35 = vmul.f32 %v5361_v48, %v6485_v24  ;;  %v4556_v41 = vpop.eup %4555  ;;  %4565 = vrsqrt.f32 %v1602_v32 }
 0x1f6   : > { %v1763_v3 = vadd.f32 %v5333_v63, %v1724_v30  ;;  %v4182_v44 = vpop.f32.mrb[50].mxu0  ;;  %v1571_v18 = vmax.f32 %v1539_v14, 0.0  ;;  %v1509_v31 = vmul.f32 %v5406_v12, %v5406_v12  ;;  %4567 = vrsqrt.f32 %v1601_v10  ;;  %4448 = vmatpush3.bf16.msra.mxu1 %v5260_v62 }
 0x1f7   : > { %v1422_v25 = vpop.f32.mrb[51].mxu0  ;;  %v1764_v48 = vadd.f32 %v5333_v63, %v1725_v35  ;;  %v1604_v23 = vadd.f32 1e-05, %v1572_v55  ;;  %v1542_v2 = vsub.f32 %v4182_v44, %v1510_v20  ;;  %v4558_v30 = vpop.eup %4557  ;;  %v6486_v57 = vsub.f32 %v5012_v9, %v5287_v47 }
 0x1f8   : > { %v1795_v17 = vmul.f32 0.01, %v1763_v3  ;;  %v5429_v53 = vpop.f32.mrb[20].mxu1  ;;  %v1541_v32 = vsub.f32 %v1422_v25, %v1509_v31  ;;  %v1603_v14 = vadd.f32 1e-05, %v1571_v18  ;;  %v4560_v35 = vpop.eup %4559  ;;  %v1698_v52 = vmul.f32 %v4556_v41, %v5306_v42 }
 0x1f9   : > { %v5431_v22 = vpop.f32.mrb[21].mxu1  ;;  %v1796_v24 = vmul.f32 0.01, %v1764_v48  ;;  %v1726_v1 = vmul.f32 %v1694_v28, %v6486_v57  ;;  %v1574_v55 = vmax.f32 %v1542_v2, 0.0  ;;  %v1512_v20 = vmul.f32 %v5429_v53, %v5429_v53 }
 0x1fa   : > { %v1827_v40 = vmax.f32 %v1763_v3, %v1795_v17  ;;  %v4185_v26 = vpop.f32.mrb[52].mxu0  ;;  %v1573_v44 = vmax.f32 %v1541_v32, 0.0  ;;  %v6487_v9 = vsub.f32 %v5007_v7, %v5283_v54  ;;  %v5451_v57 = vmul.f32 %v4558_v30, %v5306_v42 }
 0x1fb   : > { %v1432_v62 = vpop.f32.mrb[53].mxu0  ;;  %v1828_v3 = vmax.f32 %v1764_v48, %v1796_v24  ;;  %v1765_v18 = vadd.f32 %v5333_v63, %v1726_v1  ;;  %v4562_v41 = vpop.eup %4561  ;;  %4569 = vrsqrt.f32 %v1604_v23  ;;  %v1511_v25 = vmul.f32 %v5431_v22, %v5431_v22 }
 0x1fc   : > { %4220 = vmatprep.mubr.msk.f32.mxu1 %vm816_vm1, %v1827_v40  ;;  %v1727_v47 = vmul.f32 %v5379_v58, %v6487_v9  ;;  %v5448_v28 = vpop.f32.mrb[22].mxu1  ;;  %v4564_v1 = vpop.eup %4563  ;;  %v5460_v7 = vmul.f32 %v4560_v35, %v5306_v42  ;;  %4571 = vrsqrt.f32 %v1603_v14  ;;  %v1606_v23 = vadd.f32 1e-05, %v1574_v55 }
 0x1fd   : > { %v5457_v17 = vpop.f32.mrb[23].mxu1  ;;  %4221 = vmatmul.mubr.msk.f32.gmra.mrb[34].mxu1 %vm816_vm1, %v1828_v3  ;;  %v1797_v54 = vmul.f32 0.01, %v1765_v18  ;;  %v1544_v2 = vsub.f32 %v4185_v26, %v1512_v20  ;;  %v1543_v32 = vsub.f32 %v1432_v62, %v1511_v25  ;;  %v6488_v30 = vsub.f32 %v5028_v15, %v5295_v16 }
 0x1fe   : > { %v1766_v58 = vadd.f32 %v5333_v63, %v1727_v47  ;;  %v4188_v48 = vpop.f32.mrb[54].mxu0  ;;  %v1605_v9 = vadd.f32 1e-05, %v1573_v44  ;;  %v1514_v14 = vmul.f32 %v5448_v28, %v5448_v28  ;;  %v5472_v47 = vmul.f32 %v4562_v41, %v5306_v42 }
 0x1ff   : > { %v1728_v40 = vmul.f32 %v1696_v60, %v6488_v30  ;;  %v1442_v24 = vpop.f32.mrb[55].mxu0  ;;  %v1829_v10 = vmax.f32 %v1765_v18, %v1797_v54  ;;  %v4566_v3 = vpop.eup %4565  ;;  %v1576_v55 = vmax.f32 %v1544_v2, 0.0  ;;  %v5480_v60 = vmul.f32 %v4564_v1, %v5306_v42 }
 0x200   : > { %v1798_v31 = vmul.f32 0.01, %v1766_v58  ;;  %v5469_v35 = vpop.f32.mrb[24].mxu1  ;;  %v1575_v62 = vmax.f32 %v1543_v32, 0.0  ;;  %v6490_v44 = vsub.f32 %v5023_v13, %v5291_v8  ;;  %v4568_v25 = vpop.eup %4567  ;;  %4573 = vrsqrt.f32 %v1606_v23 }
 0x201   : > { %6489 = vst [vmem:[#allocation21_spill] sm:$0xff] %v5469_v35  ;;  %v1767_v15 = vadd.f32 %v5333_v63, %v1728_v40  ;;  %v5477_v16 = vpop.f32.mrb[25].mxu1  ;;  %4223 = vmatprep.mubr.msk.f32.mxu1 %vm816_vm1, %v1829_v10  ;;  %v1513_v1 = vmul.f32 %v5457_v17, %v5457_v17  ;;  %v5492_v30 = vmul.f32 %v4566_v3, %v5306_v42  ;;  %4575 = vrsqrt.f32 %v1605_v9 }
 0x202   : > { %v1830_v20 = vmax.f32 %v1766_v58, %v1798_v31  ;;  %v1729_v18 = vmul.f32 %v5410_v34, %v6490_v44  ;;  %v4191_v41 = vpop.f32.mrb[56].mxu0  ;;  %v1546_v8 = vsub.f32 %v4188_v48, %v1514_v14  ;;  %v1608_v31 = vadd.f32 1e-05, %v1576_v55 }
 0x203   : > { %v1799_v2 = vmul.f32 0.01, %v1767_v15  ;;  %v1452_v34 = vpop.f32.mrb[57].mxu0  ;;  %v1545_v23 = vsub.f32 %v1442_v24, %v1513_v1  ;;  %v6492_v32 = vsub.f32 %v5044_v21, %v5310_v50  ;;  %v5504_v3 = vmul.f32 %v4568_v25, %v5306_v42 }
 0x204   : > { %4224 = vmatmul.mubr.msk.f32.gmra.mrb[36].mxu1 %vm816_vm1, %v1830_v20  ;;  %v1768_v13 = vadd.f32 %v5333_v63, %v1729_v18  ;;  %v5496_v10 = vpop.f32.mrb[26].mxu1  ;;  %v1607_v9 = vadd.f32 1e-05, %v1575_v62  ;;  %v1578_v26 = vmax.f32 %v1546_v8, 0.0  ;;  %v1516_v21 = vmul.f32 %v5469_v35, %v5469_v35  ;;  %v6502_v35 = vld [vmem:[#allocation9_spill] sm:$0xff] }
 0x205   : > { %6491 = vst [vmem:[#allocation22_spill] sm:$0xff] %v5496_v10  ;;  %v1831_v58 = vmax.f32 %v1767_v15, %v1799_v2  ;;  %v1730_v40 = vmul.f32 %v1698_v52, %v6492_v32  ;;  %v5501_v44 = vpop.f32.mrb[27].mxu1  ;;  %v4570_v48 = vpop.eup %4569  ;;  %v1577_v24 = vmax.f32 %v1545_v23, 0.0  ;;  %v6493_v62 = vsub.f32 %v5039_v19, %v5299_v38 }
 0x206   : > { %v1800_v20 = vmul.f32 0.01, %v1768_v13  ;;  %v4194_v18 = vpop.f32.mrb[58].mxu0  ;;  %v4572_v52 = vpop.eup %4571  ;;  %v1610_v25 = vadd.f32 1e-05, %v1578_v26  ;;  %v1515_v1 = vmul.f32 %v5477_v16, %v5477_v16  ;;  %4577 = vrsqrt.f32 %v1608_v31 }
 0x207   : > { %4226 = vmatprep.mubr.msk.f32.mxu1 %vm816_vm1, %v1831_v58  ;;  %v1769_v55 = vadd.f32 %v5333_v63, %v1730_v40  ;;  %v1462_v50 = vpop.f32.mrb[59].mxu0  ;;  %v1731_v2 = vmul.f32 %v5424_v5, %v6493_v62  ;;  %v1609_v58 = vadd.f32 1e-05, %v1577_v24  ;;  %v1548_v32 = vsub.f32 %v4191_v41, %v1516_v21  ;;  %v6496_v62 = vld [vmem:[#allocation18_spill] sm:$0xff] }
 0x208   : > { %v1832_v15 = vmax.f32 %v1768_v13, %v1800_v20  ;;  %v5518_v8 = vpop.f32.mrb[28].mxu1  ;;  %v5523_v14 = vmul.f32 %v4570_v48, %v5306_v42  ;;  %4579 = vrsqrt.f32 %v1607_v9  ;;  %v1547_v38 = vsub.f32 %v1452_v34, %v1515_v1 }
 0x209   : > { %v1801_v23 = vmul.f32 0.01, %v1769_v55  ;;  %v5520_v40 = vpop.f32.mrb[29].mxu1  ;;  %v1770_v19 = vadd.f32 %v5333_v63, %v1731_v2  ;;  %4581 = vrsqrt.f32 %v1610_v25  ;;  %v1580_v31 = vmax.f32 %v1548_v32, 0.0  ;;  %v6495_v25 = vld [vmem:[#allocation8_spill] sm:$0xff] }
 0x20a   : > { %4227 = vmatmul.mubr.msk.f32.gmra.mrb[38].mxu1 %vm816_vm1, %v1832_v15  ;;  %v4197_v5 = vpop.f32.mrb[60].mxu0  ;;  %v1579_v24 = vmax.f32 %v1547_v38, 0.0  ;;  %v6494_v48 = vsub.f32 %v5060_v27, %v5328_v46  ;;  %v1518_v21 = vmul.f32 %v5496_v10, %v5496_v10  ;;  %v4574_v15 = vpop.eup %4573  ;;  %4583 = vrsqrt.f32 %v1609_v58 }
 0x20b   : > { %v1833_v13 = vmax.f32 %v1769_v55, %v1801_v23  ;;  %v5529_v20 = vpop.f32.mrb[61].mxu0  ;;  %v1802_v41 = vmul.f32 0.01, %v1770_v19  ;;  %v1612_v55 = vadd.f32 1e-05, %v1580_v31  ;;  %v6497_v2 = vsub.f32 %v6495_v25, %v6496_v62  ;;  %v6498_v62 = vld [vmem:[#allocation10_spill] sm:$0xff] }
 0x20c   : > { %v1732_v9 = vmul.f32 %v5460_v7, %v6494_v48  ;;  %v5537_v34 = vpop.f32.mrb[30].mxu1  ;;  %v1517_v27 = vmul.f32 %v5501_v44, %v5501_v44  ;;  %v4576_v7 = vpop.eup %4575  ;;  %v5549_v23 = vmul.f32 %v4572_v52, %v5306_v42  ;;  %v1611_v38 = vadd.f32 1e-05, %v1579_v24  ;;  %v6499_v52 = vld [vmem:[#allocation11_spill] sm:$0xff]  ;;  %v6500_v24 = vld [vmem:[#allocation20_spill] sm:$0xff] }
 0x20d   : > { %4229 = vmatprep.mubr.msk.f32.mxu1 %vm816_vm1, %v1833_v13  ;;  %v1733_v1 = vmul.f32 %v5451_v57, %v6497_v2  ;;  %v5546_v46 = vpop.f32.mrb[31].mxu1  ;;  %v1834_v32 = vmax.f32 %v1770_v19, %v1802_v41  ;;  %4585 = vrsqrt.f32 %v1612_v55  ;;  %v1550_v48 = vsub.f32 %v4194_v18, %v1518_v21 }
 0x20e   : > { %v1771_v58 = vadd.f32 %v5333_v63, %v1732_v9  ;;  %v5552_v13 = vpop.f32.mrb[62].mxu0  ;;  %v1549_v57 = vsub.f32 %v1462_v50, %v1517_v27  ;;  %v6501_v9 = vsub.f32 %v5076_v33, %v6500_v24  ;;  %4587 = vrsqrt.f32 %v1611_v38  ;;  %v6503_v33 = vld [vmem:[#allocation19_spill] sm:$0xff] }
 0x20f   : > { %v1772_v31 = vadd.f32 %v5333_v63, %v1733_v1  ;;  %v5555_v25 = vpop.f32.mrb[63].mxu0  ;;  %4230 = vmatmul.mubr.msk.f32.gmra.mrb[40].mxu1 %vm816_vm1, %v1834_v32  ;;  %v1709_v1 = vmul.f32 %v4574_v15, %v5306_v42  ;;  %v1582_v50 = vmax.f32 %v1550_v48, 0.0  ;;  %v1520_v32 = vmul.f32 %v5518_v8, %v5518_v8 }
 0x210   : > { %v1803_v41 = vmul.f32 0.01, %v1771_v58  ;;  %v1734_v55 = vmul.f32 %v5480_v60, %v6501_v9  ;;  %v1581_v21 = vmax.f32 %v1549_v57, 0.0  ;;  %v4578_v26 = vpop.eup %4577  ;;  %v6504_v24 = vsub.f32 %v6502_v35, %v6503_v33 }
 0x211   : > { %v1804_v18 = vmul.f32 0.01, %v1772_v31  ;;  %v1614_v54 = vadd.f32 1e-05, %v1582_v50  ;;  %v1708_v48 = vmul.f32 %v4576_v7, %v5306_v42  ;;  %v1552_v57 = vsub.f32 %v4197_v5, %v1520_v32 }
 0x212   : > { %v1835_v27 = vmax.f32 %v1771_v58, %v1803_v41  ;;  %v1773_v2 = vadd.f32 %v5333_v63, %v1734_v55  ;;  %v1613_v10 = vadd.f32 1e-05, %v1581_v21  ;;  %v1735_v60 = vmul.f32 %v5472_v47, %v6504_v24  ;;  %v4580_v15 = vpop.eup %4579 }
 0x213   : > { %v1836_v19 = vmax.f32 %v1772_v31, %v1804_v18  ;;  %v1519_v58 = vmul.f32 %v5520_v40, %v5520_v40  ;;  %v4582_v41 = vpop.eup %4581  ;;  %v6505_v31 = vld [vmem:[#allocation13_spill] sm:$0xff]  ;;  %4589 = vrsqrt.f32 %v1614_v54  ;;  %v6506_v47 = vsub.f32 %v5092_v39, %v5370_v11 }
 0x214   : > { %4232 = vmatprep.mubr.msk.f32.mxu1 %vm816_vm1, %v1835_v27  ;;  %v1805_v38 = vmul.f32 0.01, %v1773_v2  ;;  %v1677_v9 = vsub.f32 %v6505_v31, %v5501_v44  ;;  %v1774_v35 = vadd.f32 %v5333_v63, %v1735_v60  ;;  %v1711_v55 = vmul.f32 %v4578_v26, %v5306_v42  ;;  %v4584_v5 = vpop.eup %4583  ;;  %v6522_v44 = vld [vmem:[#allocation15_spill] sm:$0xff] }
 0x215   : > { %4233 = vmatmul.mubr.msk.f32.gmra.mrb[42].mxu1 %vm816_vm1, %v1836_v19  ;;  %v1736_v7 = vmul.f32 %v5504_v3, %v6506_v47  ;;  %4591 = vrsqrt.f32 %v1613_v10  ;;  %v1584_v50 = vmax.f32 %v1552_v57, 0.0  ;;  %v1551_v19 = vsub.f32 %v5529_v20, %v1519_v58 }
 0x216   : > { %v1837_v18 = vmax.f32 %v1773_v2, %v1805_v38  ;;  %v1806_v21 = vmul.f32 0.01, %v1774_v35  ;;  %v1522_v54 = vmul.f32 %v5537_v34, %v5537_v34  ;;  %v1710_v32 = vmul.f32 %v4580_v15, %v5306_v42 }
 0x217   : > { %v1775_v27 = vadd.f32 %v5333_v63, %v1736_v7  ;;  %v1616_v39 = vadd.f32 1e-05, %v1584_v50  ;;  %v6507_v11 = vsub.f32 %v5087_v37, %v5366_v36  ;;  %v1521_v3 = vmul.f32 %v5546_v46, %v5546_v46  ;;  %v4586_v26 = vpop.eup %4585 }
 0x218   : > { %4235 = vmatprep.mubr.msk.f32.mxu1 %vm816_vm1, %v1837_v18  ;;  %v1713_v20 = vmul.f32 %v4582_v41, %v5306_v42  ;;  %v1838_v2 = vmax.f32 %v1774_v35, %v1806_v21  ;;  %v1583_v33 = vmax.f32 %v1551_v19, 0.0  ;;  %v1712_v60 = vmul.f32 %v4584_v5, %v5306_v42  ;;  %v4588_v57 = vpop.eup %4587 }
 0x219   : > { %v1737_v10 = vmul.f32 %v5492_v30, %v6507_v11  ;;  %v1807_v24 = vmul.f32 0.01, %v1775_v27  ;;  %4593 = vrsqrt.f32 %v1616_v39  ;;  %v1554_v38 = vsub.f32 %v5552_v13, %v1522_v54 }
 0x21a   : > { %v1715_v37 = vmul.f32 %v4586_v26, %v5306_v42  ;;  %4236 = vmatmul.mubr.msk.f32.gmra.mrb[44].mxu1 %vm816_vm1, %v1838_v2  ;;  %v1615_v36 = vadd.f32 1e-05, %v1583_v33  ;;  %v1553_v58 = vsub.f32 %v5555_v25, %v1521_v3  ;;  %v6508_v47 = vsub.f32 %v5108_v45, %v5387_v29 }
 0x21b   : > { %v1776_v15 = vadd.f32 %v5333_v63, %v1737_v10  ;;  %v1839_v30 = vmax.f32 %v1775_v27, %v1807_v24  ;;  %v1586_v35 = vmax.f32 %v1554_v38, 0.0  ;;  %v6509_v18 = vsub.f32 %v5103_v43, %v5383_v61 }
 0x21c   : > { %v1738_v7 = vmul.f32 %v5549_v23, %v6508_v47  ;;  %4595 = vrsqrt.f32 %v1615_v36  ;;  %v1585_v50 = vmax.f32 %v1553_v58, 0.0  ;;  %v6510_v25 = vsub.f32 %v5124_v51, %v5406_v12 }
 0x21d   : > { %v1808_v41 = vmul.f32 0.01, %v1776_v15  ;;  %v1739_v13 = vmul.f32 %v5523_v14, %v6509_v18  ;;  %4238 = vmatprep.mubr.msk.f32.mxu1 %vm816_vm1, %v1839_v30  ;;  %v6511_v21 = vsub.f32 %v5119_v49, %v5402_v6  ;;  %v1618_v29 = vadd.f32 1e-05, %v1586_v35  ;;  %v4590_v61 = vpop.eup %4589 }
 0x21e   : > { %v1740_v5 = vmul.f32 %v1708_v48, %v6510_v25  ;;  %v1777_v23 = vadd.f32 %v5333_v63, %v1738_v7  ;;  %v1617_v14 = vadd.f32 1e-05, %v1585_v50  ;;  %v6512_v51 = vsub.f32 %v5140_v59, %v5431_v22  ;;  %v6521_v50 = vld [vmem:[#allocation14_spill] sm:$0xff] }
 0x21f   : > { %v1741_v19 = vmul.f32 %v1709_v1, %v6511_v21  ;;  %v1840_v45 = vmax.f32 %v1776_v15, %v1808_v41  ;;  %v1778_v43 = vadd.f32 %v5333_v63, %v1739_v13  ;;  %v4592_v48 = vpop.eup %4591  ;;  %v1714_v49 = vmul.f32 %v4588_v57, %v5306_v42 }
 0x220   : > { %v1779_v27 = vadd.f32 %v5333_v63, %v1740_v5  ;;  %v1742_v12 = vmul.f32 %v1710_v32, %v6512_v51  ;;  %4597 = vrsqrt.f32 %v1618_v29  ;;  %v1809_v6 = vmul.f32 0.01, %v1777_v23  ;;  %v6523_v5 = vld [vmem:[#allocation16_spill] sm:$0xff] }
 0x221   : > { %v1780_v54 = vadd.f32 %v5333_v63, %v1741_v19  ;;  %4239 = vmatmul.mubr.msk.f32.gmra.mrb[46].mxu1 %vm816_vm1, %v1840_v45  ;;  %v1810_v1 = vmul.f32 0.01, %v1778_v43  ;;  %v1717_v39 = vmul.f32 %v4590_v61, %v5306_v42  ;;  %v1716_v11 = vmul.f32 %v4592_v48, %v5306_v42 }
 0x222   : > { %4599 = vrsqrt.f32 %v1617_v14  ;;  %v1811_v10 = vmul.f32 0.01, %v1779_v27  ;;  %v1841_v3 = vmax.f32 %v1777_v23, %v1809_v6  ;;  %v1781_v2 = vadd.f32 %v5333_v63, %v1742_v12 }
 0x223   : > { %v1812_v26 = vmul.f32 0.01, %v1780_v54  ;;  %v6513_v59 = vsub.f32 %v5135_v56, %v5429_v53  ;;  %v1842_v32 = vmax.f32 %v1778_v43, %v1810_v1  ;;  %v6514_v24 = vsub.f32 %v5156_v4, %v5457_v17  ;;  %v4594_v30 = vpop.eup %4593  ;;  %v6519_v4 = vld [vmem:[#allocation22_spill] sm:$0xff]  ;;  %v6520_v17 = vld [vmem:[#allocation12_spill] sm:$0xff] }
 0x224   : > { %v1843_v33 = vmax.f32 %v1779_v27, %v1811_v10  ;;  %v6515_v38 = vsub.f32 %v5151_v0, %v5448_v28  ;;  %4241 = vmatprep.mubr.msk.f32.mxu1 %vm816_vm1, %v1841_v3  ;;  %v1813_v58 = vmul.f32 0.01, %v1781_v2  ;;  %v6516_v56 = vsub.f32 %v6499_v52, %v5477_v16 }
 0x225   : > { %v1743_v22 = vmul.f32 %v1711_v55, %v6513_v59  ;;  %v1744_v15 = vmul.f32 %v1712_v60, %v6514_v24  ;;  %v6517_v55 = vld [vmem:[#allocation21_spill] sm:$0xff]  ;;  %v1678_v60 = vsub.f32 %v6520_v17, %v6519_v4  ;;  %4242 = vmatmul.mubr.msk.f32.gmra.mrb[48].mxu1 %vm816_vm1, %v1842_v32  ;;  %v1748_v28 = vmul.f32 %v1716_v11, %v1677_v9 }
 0x226   : > { %v1745_v36 = vmul.f32 %v1713_v20, %v6515_v38  ;;  %v1746_v53 = vmul.f32 %v1714_v49, %v6516_v56  ;;  %v6518_v41 = vsub.f32 %v6498_v62, %v6517_v55  ;;  %v1719_v20 = vmul.f32 %v4594_v30, %v5306_v42  ;;  %4244 = vmatprep.mubr.msk.f32.mxu1 %vm816_vm1, %v1843_v33  ;;  %v5695_v56 = vld [vmem:[%s6437_s6] ss:$0 sm:$0xff] }
 0x227   : > { %v1782_v57 = vadd.f32 %v5333_v63, %v1743_v22  ;;  %v1783_v0 = vadd.f32 %v5333_v63, %v1744_v15  ;;  %v1844_v16 = vmax.f32 %v1780_v54, %v1812_v26  ;;  %v1845_v52 = vmax.f32 %v1781_v2, %v1813_v58 }
 0x228   : > { %v1747_v35 = vmul.f32 %v1715_v37, %v6518_v41  ;;  %v1785_v62 = vadd.f32 %v5333_v63, %v1746_v53  ;;  %v4596_v37 = vpop.eup %4595  ;;  %v1784_v18 = vadd.f32 %v5333_v63, %v1745_v36  ;;  %v1749_v13 = vmul.f32 %v1717_v39, %v1678_v60 }
 0x229   : > { %v1814_v47 = vmul.f32 0.01, %v1782_v57  ;;  %v1815_v7 = vmul.f32 0.01, %v1783_v0  ;;  %v1680_v25 = vsub.f32 %v6521_v50, %v5518_v8  ;;  %v1679_v31 = vsub.f32 %v6522_v44, %v5520_v40  ;;  %4245 = vmatmul.mubr.msk.f32.gmra.mrb[50].mxu1 %vm816_vm1, %v1844_v16 }
 0x22a   : > { %v1718_v9 = vmul.f32 %v4596_v37, %v5306_v42  ;;  %v1682_v21 = vsub.f32 %v6523_v5, %v5537_v34  ;;  %v1787_v19 = vadd.f32 %v5333_v63, %v1748_v28  ;;  %v4598_v45 = vpop.eup %4597  ;;  %4247 = vmatprep.mubr.msk.f32.mxu1 %vm816_vm1, %v1845_v52  ;;  %v1817_v23 = vmul.f32 0.01, %v1785_v62  ;;  %v6524_v34 = vld [vmem:[#allocation17_spill] sm:$0xff] }
 0x22b   : > { %v1847_v29 = vmax.f32 %v1783_v0, %v1815_v7  ;;  %v1751_v61 = vmul.f32 %v1719_v20, %v1680_v25  ;;  %v1721_v14 = vmul.f32 %v4598_v45, %v5306_v42  ;;  %v1846_v40 = vmax.f32 %v1782_v57, %v1814_v47 }
 0x22c   : > { %v1750_v43 = vmul.f32 %v1718_v9, %v1679_v31  ;;  %v4600_v8 = vpop.eup %4599  ;;  %v1816_v27 = vmul.f32 0.01, %v1784_v18  ;;  %v1786_v54 = vadd.f32 %v5333_v63, %v1747_v35  ;;  %v1681_v51 = vsub.f32 %v6524_v34, %v5546_v46 }
 0x22d   : > { %v1720_v12 = vmul.f32 %v4600_v8, %v5306_v42  ;;  %4248 = vmatmul.mubr.msk.f32.gmra.mrb[52].mxu1 %vm816_vm1, %v1846_v40  ;;  %v1753_v48 = vmul.f32 %v1721_v14, %v1682_v21  ;;  %v1849_v49 = vmax.f32 %v1785_v62, %v1817_v23  ;;  %v1819_v6 = vmul.f32 0.01, %v1787_v19 }
 0x22e   : > { %4250 = vmatprep.mubr.msk.f32.mxu1 %vm816_vm1, %v1847_v29  ;;  %v1789_v1 = vadd.f32 %v5333_v63, %v1750_v43  ;;  %v1848_v11 = vmax.f32 %v1784_v18, %v1816_v27  ;;  %v1818_v10 = vmul.f32 0.01, %v1786_v54  ;;  %v1788_v3 = vadd.f32 %v5333_v63, %v1749_v13 }
 0x22f   : > { %v1752_v39 = vmul.f32 %v1720_v12, %v1681_v51  ;;  %v1851_v46 = vmax.f32 %v1787_v19, %v1819_v6  ;;  %v1790_v22 = vadd.f32 %v5333_v63, %v1751_v61  ;;  %v1792_v38 = vadd.f32 %v5333_v63, %v1753_v48 }
 0x230   : > { %v1821_v42 = vmul.f32 0.01, %v1789_v1  ;;  %v1850_v2 = vmax.f32 %v1786_v54, %v1818_v10  ;;  %v1820_v59 = vmul.f32 0.01, %v1788_v3 }
 0x231   : > { %4251 = vmatmul.mubr.msk.f32.gmra.mrb[54].mxu1 %vm816_vm1, %v1848_v11  ;;  %v1791_v26 = vadd.f32 %v5333_v63, %v1752_v39  ;;  %v1822_v15 = vmul.f32 0.01, %v1790_v22  ;;  %v1824_v58 = vmul.f32 0.01, %v1792_v38 }
 0x232   : > { %4253 = vmatprep.mubr.msk.f32.mxu1 %vm816_vm1, %v1849_v49  ;;  %v1853_v32 = vmax.f32 %v1789_v1, %v1821_v42  ;;  %v1852_v24 = vmax.f32 %v1788_v3, %v1820_v59 }
 0x233   : > { %v1823_v33 = vmul.f32 0.01, %v1791_v26  ;;  %v1854_v30 = vmax.f32 %v1790_v22, %v1822_v15  ;;  %v1856_v57 = vmax.f32 %v1792_v38, %v1824_v58 }
 0x235   : > { %4254 = vmatmul.mubr.msk.f32.gmra.mrb[56].mxu1 %vm816_vm1, %v1850_v2  ;;  %v1855_v36 = vmax.f32 %v1791_v26, %v1823_v33 }
 0x236   : > { %4256 = vmatprep.mubr.msk.f32.mxu1 %vm816_vm1, %v1851_v46 }
 0x239   : > { %4257 = vmatmul.mubr.msk.f32.gmra.mrb[58].mxu1 %vm816_vm1, %v1852_v24 }
 0x23a   : > { %4259 = vmatprep.mubr.msk.f32.mxu1 %vm816_vm1, %v1853_v32 }
 0x23d   : > { %4260 = vmatmul.mubr.msk.f32.gmra.mrb[60].mxu1 %vm816_vm1, %v1854_v30 }
 0x23e   : > { %4262 = vmatprep.mubr.msk.f32.mxu1 %vm816_vm1, %v1855_v36 }
 0x241   : > { %4263 = vmatmul.mubr.msk.f32.gmra.mrb[62].mxu1 %vm816_vm1, %v1856_v57 }
 0x2c4   : > { %v4219_v63 = vpop.f32.mrb[32].mxu1 }
 0x2c5   : > { %v5698_v53 = vadd.f32 %v4219_v63, %v5695_v56  ;;  %v2034_v55 = vpop.f32.mrb[33].mxu1 }
 0x2c6   : > { %v5701_v41 = vadd.f32 %v5695_v56, %v2034_v55 }
 0x2c7   : > { %v2520_v4 = vmul.f32 %v5698_v53, %v5698_v53 }
 0x2c8   : > { %v2519_v35 = vmul.f32 %v5701_v41, %v5701_v41  ;;  %4273 = vmatprep.mubr.msk.f32.mxu0 %vm2197_vm2, %v5701_v41 }
 0x2c9   : > { %4274 = vmatmul.mubr.msk.f32.vlgmr.msra.gmra.mrb[64].mxu0 %vm2197_vm2, %v5698_v53 }
 0x2ca   : > { %4329 = vmatprep.mubr.msk.f32.mxu1 %vm2197_vm2, %v2519_v35 }
 0x2cb   : > { %4330 = vmatmul.mubr.msk.f32.vlgmr.msra.gmra.mrb[64].mxu1 %vm2197_vm2, %v2520_v4 }
 0x2d0   : > { %v4222_v17 = vpop.f32.mrb[34].mxu1 }
 0x2d1   : > { %v5714_v60 = vadd.f32 %v4222_v17, %v5695_v56  ;;  %v2044_v0 = vpop.f32.mrb[35].mxu1 }
 0x2d2   : > { %v5717_v28 = vadd.f32 %v5695_v56, %v2044_v0 }
 0x2d3   : > { %v2522_v16 = vmul.f32 %v5714_v60, %v5714_v60 }
 0x2d4   : > { %v2521_v20 = vmul.f32 %v5717_v28, %v5717_v28  ;;  %4276 = vmatprep.mubr.msk.f32.mxu0 %vm2197_vm2, %v5717_v28 }
 0x2d5   : > { %4277 = vmatmul.mubr.msk.f32.gmra.mrb[66].mxu0 %vm2197_vm2, %v5714_v60 }
 0x2d6   : > { %4332 = vmatprep.mubr.msk.f32.mxu1 %vm2197_vm2, %v2521_v20 }
 0x2d7   : > { %v4225_v52 = vpop.f32.mrb[36].mxu1  ;;  %4333 = vmatmul.mubr.msk.f32.gmra.mrb[66].mxu1 %vm2197_vm2, %v2522_v16 }
 0x2d8   : > { %v5729_v62 = vadd.f32 %v4225_v52, %v5695_v56  ;;  %v2054_v37 = vpop.f32.mrb[37].mxu1 }
 0x2d9   : > { %v5733_v47 = vadd.f32 %v5695_v56, %v2054_v37 }
 0x2da   : > { %v2524_v18 = vmul.f32 %v5729_v62, %v5729_v62 }
 0x2db   : > { %v2523_v7 = vmul.f32 %v5733_v47, %v5733_v47  ;;  %4279 = vmatprep.mubr.msk.f32.mxu0 %vm2197_vm2, %v5733_v47 }
 0x2dc   : > { %4280 = vmatmul.mubr.msk.f32.gmra.mrb[68].mxu0 %vm2197_vm2, %v5729_v62 }
 0x2dd   : > { %v4228_v13 = vpop.f32.mrb[38].mxu1  ;;  %4335 = vmatprep.mubr.msk.f32.mxu1 %vm2197_vm2, %v2523_v7 }
 0x2de   : > { %v5745_v50 = vadd.f32 %v4228_v13, %v5695_v56  ;;  %v2064_v25 = vpop.f32.mrb[39].mxu1  ;;  %4336 = vmatmul.mubr.msk.f32.gmra.mrb[68].mxu1 %vm2197_vm2, %v2524_v18 }
 0x2df   : > { %v5749_v44 = vadd.f32 %v5695_v56, %v2064_v25 }
 0x2e0   : > { %v2526_v9 = vmul.f32 %v5745_v50, %v5745_v50 }
 0x2e1   : > { %v2525_v31 = vmul.f32 %v5749_v44, %v5749_v44  ;;  %4282 = vmatprep.mubr.msk.f32.mxu0 %vm2197_vm2, %v5749_v44 }
 0x2e2   : > { %4283 = vmatmul.mubr.msk.f32.gmra.mrb[70].mxu0 %vm2197_vm2, %v5745_v50  ;;  %v4231_v5 = vpop.f32.mrb[40].mxu1 }
 0x2e3   : > { %4338 = vmatprep.mubr.msk.f32.mxu1 %vm2197_vm2, %v2525_v31  ;;  %v5761_v21 = vadd.f32 %v4231_v5, %v5695_v56  ;;  %v2074_v19 = vpop.f32.mrb[41].mxu1 }
 0x2e4   : > { %4339 = vmatmul.mubr.msk.f32.gmra.mrb[70].mxu1 %vm2197_vm2, %v2526_v9  ;;  %v5765_v45 = vadd.f32 %v5695_v56, %v2074_v19 }
 0x2e5   : > { %v2528_v23 = vmul.f32 %v5761_v21, %v5761_v21 }
 0x2e6   : > { %v2527_v29 = vmul.f32 %v5765_v45, %v5765_v45  ;;  %4285 = vmatprep.mubr.msk.f32.mxu0 %vm2197_vm2, %v5765_v45 }
 0x2e7   : > { %4286 = vmatmul.mubr.msk.f32.gmra.mrb[72].mxu0 %vm2197_vm2, %v5761_v21 }
 0x2e8   : > { %v4234_v43 = vpop.f32.mrb[42].mxu1  ;;  %4341 = vmatprep.mubr.msk.f32.mxu1 %vm2197_vm2, %v2527_v29 }
 0x2e9   : > { %v5776_v61 = vadd.f32 %v4234_v43, %v5695_v56  ;;  %v2084_v8 = vpop.f32.mrb[43].mxu1  ;;  %4342 = vmatmul.mubr.msk.f32.gmra.mrb[72].mxu1 %vm2197_vm2, %v2528_v23 }
 0x2ea   : > { %v5780_v14 = vadd.f32 %v5695_v56, %v2084_v8 }
 0x2eb   : > { %v2530_v27 = vmul.f32 %v5776_v61, %v5776_v61 }
 0x2ec   : > { %v2529_v40 = vmul.f32 %v5780_v14, %v5780_v14  ;;  %4288 = vmatprep.mubr.msk.f32.mxu0 %vm2197_vm2, %v5780_v14 }
 0x2ed   : > { %4289 = vmatmul.mubr.msk.f32.gmra.mrb[74].mxu0 %vm2197_vm2, %v5776_v61  ;;  %v4237_v54 = vpop.f32.mrb[44].mxu1 }
 0x2ee   : > { %4344 = vmatprep.mubr.msk.f32.mxu1 %vm2197_vm2, %v2529_v40  ;;  %v5793_v34 = vadd.f32 %v4237_v54, %v5695_v56  ;;  %v2094_v51 = vpop.f32.mrb[45].mxu1 }
 0x2ef   : > { %4345 = vmatmul.mubr.msk.f32.gmra.mrb[74].mxu1 %vm2197_vm2, %v2530_v27  ;;  %v5797_v12 = vadd.f32 %v5695_v56, %v2094_v51 }
 0x2f0   : > { %v2532_v49 = vmul.f32 %v5793_v34, %v5793_v34 }
 0x2f1   : > { %v2531_v48 = vmul.f32 %v5797_v12, %v5797_v12  ;;  %4291 = vmatprep.mubr.msk.f32.mxu0 %vm2197_vm2, %v5797_v12 }
 0x2f2   : > { %4292 = vmatmul.mubr.msk.f32.gmra.mrb[76].mxu0 %vm2197_vm2, %v5793_v34 }
 0x2f3   : > { %4347 = vmatprep.mubr.msk.f32.mxu1 %vm2197_vm2, %v2531_v48 }
 0x2f4   : > { %v4240_v6 = vpop.f32.mrb[46].mxu1  ;;  %4348 = vmatmul.mubr.msk.f32.gmra.mrb[76].mxu1 %vm2197_vm2, %v2532_v49 }
 0x2f5   : > { %v5808_v1 = vadd.f32 %v4240_v6, %v5695_v56  ;;  %v2104_v39 = vpop.f32.mrb[47].mxu1 }
 0x2f6   : > { %v5812_v11 = vadd.f32 %v5695_v56, %v2104_v39 }
 0x2f7   : > { %v2534_v3 = vmul.f32 %v5808_v1, %v5808_v1 }
 0x2f8   : > { %v2533_v10 = vmul.f32 %v5812_v11, %v5812_v11  ;;  %4294 = vmatprep.mubr.msk.f32.mxu0 %vm2197_vm2, %v5812_v11  ;;  %v4243_v46 = vpop.f32.mrb[48].mxu1 }
 0x2f9   : > { %4295 = vmatmul.mubr.msk.f32.gmra.mrb[78].mxu0 %vm2197_vm2, %v5808_v1  ;;  %v5824_v42 = vadd.f32 %v4243_v46, %v5695_v56  ;;  %v2114_v26 = vpop.f32.mrb[49].mxu1 }
 0x2fa   : > { %4350 = vmatprep.mubr.msk.f32.mxu1 %vm2197_vm2, %v2533_v10  ;;  %v5828_v2 = vadd.f32 %v5695_v56, %v2114_v26 }
 0x2fb   : > { %4351 = vmatmul.mubr.msk.f32.gmra.mrb[78].mxu1 %vm2197_vm2, %v2534_v3  ;;  %v2536_v32 = vmul.f32 %v5824_v42, %v5824_v42 }
 0x2fc   : > { %v2535_v59 = vmul.f32 %v5828_v2, %v5828_v2  ;;  %v4246_v22 = vpop.f32.mrb[50].mxu1  ;;  %4297 = vmatprep.mubr.msk.f32.mxu0 %vm2197_vm2, %v5828_v2 }
 0x2fd   : > { %v5838_v33 = vadd.f32 %v4246_v22, %v5695_v56  ;;  %v2124_v24 = vpop.f32.mrb[51].mxu1  ;;  %4298 = vmatmul.mubr.msk.f32.gmra.mrb[80].mxu0 %vm2197_vm2, %v5824_v42 }
 0x2fe   : > { %v5843_v15 = vadd.f32 %v5695_v56, %v2124_v24  ;;  %4353 = vmatprep.mubr.msk.f32.mxu1 %vm2197_vm2, %v2535_v59 }
 0x2ff   : > { %4354 = vmatmul.mubr.msk.f32.gmra.mrb[80].mxu1 %vm2197_vm2, %v2536_v32  ;;  %v2538_v30 = vmul.f32 %v5838_v33, %v5838_v33 }
 0x300   : > { %v2537_v38 = vmul.f32 %v5843_v15, %v5843_v15  ;;  %v4249_v36 = vpop.f32.mrb[52].mxu1  ;;  %4300 = vmatprep.mubr.msk.f32.mxu0 %vm2197_vm2, %v5843_v15 }
 0x301   : > { %v5854_v58 = vadd.f32 %v4249_v36, %v5695_v56  ;;  %v2134_v57 = vpop.f32.mrb[53].mxu1  ;;  %4301 = vmatmul.mubr.msk.f32.gmra.mrb[82].mxu0 %vm2197_vm2, %v5838_v33 }
 0x302   : > { %v5859_v63 = vadd.f32 %v5695_v56, %v2134_v57  ;;  %4356 = vmatprep.mubr.msk.f32.mxu1 %vm2197_vm2, %v2537_v38 }
 0x303   : > { %4357 = vmatmul.mubr.msk.f32.gmra.mrb[82].mxu1 %vm2197_vm2, %v2538_v30  ;;  %v2540_v4 = vmul.f32 %v5854_v58, %v5854_v58 }
 0x304   : > { %v2539_v55 = vmul.f32 %v5859_v63, %v5859_v63  ;;  %v4252_v35 = vpop.f32.mrb[54].mxu1  ;;  %4303 = vmatprep.mubr.msk.f32.mxu0 %vm2197_vm2, %v5859_v63 }
 0x305   : > { %v5870_v17 = vadd.f32 %v4252_v35, %v5695_v56  ;;  %v2144_v0 = vpop.f32.mrb[55].mxu1  ;;  %4304 = vmatmul.mubr.msk.f32.gmra.mrb[84].mxu0 %vm2197_vm2, %v5854_v58 }
 0x306   : > { %v5875_v20 = vadd.f32 %v5695_v56, %v2144_v0  ;;  %4359 = vmatprep.mubr.msk.f32.mxu1 %vm2197_vm2, %v2539_v55 }
 0x307   : > { %4360 = vmatmul.mubr.msk.f32.gmra.mrb[84].mxu1 %vm2197_vm2, %v2540_v4  ;;  %v2542_v37 = vmul.f32 %v5870_v17, %v5870_v17 }
 0x308   : > { %v2541_v16 = vmul.f32 %v5875_v20, %v5875_v20  ;;  %v4255_v52 = vpop.f32.mrb[56].mxu1  ;;  %4306 = vmatprep.mubr.msk.f32.mxu0 %vm2197_vm2, %v5875_v20 }
 0x309   : > { %v5886_v7 = vadd.f32 %v4255_v52, %v5695_v56  ;;  %v2154_v18 = vpop.f32.mrb[57].mxu1  ;;  %4307 = vmatmul.mubr.msk.f32.gmra.mrb[86].mxu0 %vm2197_vm2, %v5870_v17 }
 0x30a   : > { %v5891_v13 = vadd.f32 %v5695_v56, %v2154_v18  ;;  %4362 = vmatprep.mubr.msk.f32.mxu1 %vm2197_vm2, %v2541_v16 }
 0x30b   : > { %4363 = vmatmul.mubr.msk.f32.gmra.mrb[86].mxu1 %vm2197_vm2, %v2542_v37  ;;  %v2544_v9 = vmul.f32 %v5886_v7, %v5886_v7 }
 0x30c   : > { %v2543_v25 = vmul.f32 %v5891_v13, %v5891_v13  ;;  %v4258_v31 = vpop.f32.mrb[58].mxu1  ;;  %4309 = vmatprep.mubr.msk.f32.mxu0 %vm2197_vm2, %v5891_v13 }
 0x30d   : > { %v5902_v5 = vadd.f32 %v4258_v31, %v5695_v56  ;;  %v2164_v19 = vpop.f32.mrb[59].mxu1  ;;  %4310 = vmatmul.mubr.msk.f32.gmra.mrb[88].mxu0 %vm2197_vm2, %v5886_v7 }
 0x30e   : > { %v5907_v29 = vadd.f32 %v5695_v56, %v2164_v19  ;;  %4365 = vmatprep.mubr.msk.f32.mxu1 %vm2197_vm2, %v2543_v25  ;;  %v5964_v19 = vld [vmem:[%s6438_s7] ss:$0 sm:$0xff] }
 0x30f   : > { %4366 = vmatmul.mubr.msk.f32.gmra.mrb[88].mxu1 %vm2197_vm2, %v2544_v9  ;;  %v2546_v8 = vmul.f32 %v5902_v5, %v5902_v5 }
 0x310   : > { %v2545_v23 = vmul.f32 %v5907_v29, %v5907_v29  ;;  %v4261_v43 = vpop.f32.mrb[60].mxu1  ;;  %4312 = vmatprep.mubr.msk.f32.mxu0 %vm2197_vm2, %v5907_v29 }
 0x311   : > { %v5918_v40 = vadd.f32 %v4261_v43, %v5695_v56  ;;  %v2174_v27 = vpop.f32.mrb[61].mxu1  ;;  %4313 = vmatmul.mubr.msk.f32.gmra.mrb[90].mxu0 %vm2197_vm2, %v5902_v5 }
 0x312   : > { %v5923_v54 = vadd.f32 %v5695_v56, %v2174_v27  ;;  %4368 = vmatprep.mubr.msk.f32.mxu1 %vm2197_vm2, %v2545_v23 }
 0x313   : > { %4369 = vmatmul.mubr.msk.f32.gmra.mrb[90].mxu1 %vm2197_vm2, %v2546_v8  ;;  %v2548_v49 = vmul.f32 %v5918_v40, %v5918_v40 }
 0x314   : > { %v2547_v51 = vmul.f32 %v5923_v54, %v5923_v54  ;;  %v4264_v48 = vpop.f32.mrb[62].mxu1  ;;  %4315 = vmatprep.mubr.msk.f32.mxu0 %vm2197_vm2, %v5923_v54 }
 0x315   : > { %v5934_v6 = vadd.f32 %v4264_v48, %v5695_v56  ;;  %v2184_v39 = vpop.f32.mrb[63].mxu1  ;;  %4316 = vmatmul.mubr.msk.f32.gmra.mrb[92].mxu0 %vm2197_vm2, %v5918_v40  ;;  %v5975_v48 = vld [vmem:[%s6440_s9] sm:$0x1] }
 0x316   : > { %v5939_v10 = vadd.f32 %v5695_v56, %v2184_v39  ;;  %4371 = vmatprep.mubr.msk.f32.mxu1 %vm2197_vm2, %v2547_v51  ;;  %6526 = vst [vmem:[#allocation18_spill] sm:$0xff] %v5975_v48 }
 0x317   : > { %6525 = vst [vmem:[#allocation8_spill] sm:$0xff] %v5934_v6  ;;  %4372 = vmatmul.mubr.msk.f32.gmra.mrb[92].mxu1 %vm2197_vm2, %v2548_v49  ;;  %v2550_v46 = vmul.f32 %v5934_v6, %v5934_v6 }
 0x318   : > { %v2549_v3 = vmul.f32 %v5939_v10, %v5939_v10  ;;  %4318 = vmatprep.mubr.msk.f32.mxu0 %vm2197_vm2, %v5939_v10 }
 0x319   : > { %4319 = vmatmul.mubr.msk.f32.gmra.mrb[94].mxu0 %vm2197_vm2, %v5934_v6 }
 0x31a   : > { %4374 = vmatprep.mubr.msk.f32.mxu1 %vm2197_vm2, %v2549_v3  ;;  %4013 = vmatprep.mubr.msk.f32.mxu0 %vm2197_vm2, %v5975_v48 }
 0x31b   : > { %4375 = vmatmul.mubr.msk.f32.gmra.mrb[94].mxu1 %vm2197_vm2, %v2550_v46 }
 0x39c   : > { %v4275_v56 = vpop.f32.mrb[64].mxu0 }
 0x39d   : > { %v2873_v26 = vmul.f32 %v4275_v56, %v4275_v56  ;;  %v2360_v59 = vpop.f32.mrb[65].mxu0 }
 0x39e   : > { %v2872_v22 = vmul.f32 %v2360_v59, %v2360_v59  ;;  %v4331_v32 = vpop.f32.mrb[64].mxu1 }
 0x39f   : > { %v2905_v24 = vsub.f32 %v4331_v32, %v2873_v26  ;;  %v2713_v38 = vpop.f32.mrb[65].mxu1 }
 0x3a0   : > { %v2904_v36 = vsub.f32 %v2713_v38, %v2872_v22 }
 0x3a1   : > { %v2937_v30 = vmax.f32 %v2905_v24, 0.0  ;;  %v3033_v24 = vsub.f32 %v5698_v53, %v4275_v56 }
 0x3a2   : > { %v2936_v57 = vmax.f32 %v2904_v36, 0.0 }
 0x3a3   : > { %v2969_v55 = vadd.f32 1e-05, %v2937_v30  ;;  %v3032_v30 = vsub.f32 %v5701_v41, %v2360_v59 }
 0x3a4   : > { %v2968_v35 = vadd.f32 1e-05, %v2936_v57 }
 0x3a5   : > { %4601 = vrsqrt.f32 %v2969_v55 }
 0x3a6   : > { %4603 = vrsqrt.f32 %v2968_v35  ;;  %v5988_v35 = vld [vmem:[%s6439_s8] ss:$0 sm:$0xff] }
 0x3a8   : > { %v5953_v4 = vpop.f32.mrb[66].mxu0 }
 0x3a9   : > { %v2875_v0 = vmul.f32 %v5953_v4, %v5953_v4  ;;  %v5957_v16 = vpop.f32.mrb[67].mxu0 }
 0x3aa   : > { %v2874_v52 = vmul.f32 %v5957_v16, %v5957_v16  ;;  %v4334_v37 = vpop.f32.mrb[66].mxu1 }
 0x3ab   : > { %v2907_v18 = vsub.f32 %v4334_v37, %v2875_v0  ;;  %v2723_v25 = vpop.f32.mrb[67].mxu1 }
 0x3ac   : > { %v2906_v31 = vsub.f32 %v2723_v25, %v2874_v52 }
 0x3ad   : > { %v2939_v9 = vmax.f32 %v2907_v18, 0.0 }
 0x3ae   : > { %v2938_v23 = vmax.f32 %v2906_v31, 0.0 }
 0x3af   : > { %v5966_v43 = vpop.f32.mrb[68].mxu0  ;;  %v2971_v8 = vadd.f32 1e-05, %v2939_v9  ;;  %v4602_v46 = vpop.eup %4601 }
 0x3b0   : > { %v2877_v27 = vmul.f32 %v5966_v43, %v5966_v43  ;;  %v5970_v51 = vpop.f32.mrb[69].mxu0  ;;  %v2970_v49 = vadd.f32 1e-05, %v2938_v23  ;;  %v4604_v32 = vpop.eup %4603  ;;  %v3072_v38 = vmul.f32 %v4602_v46, %v5964_v19 }
 0x3b1   : > { %v2876_v39 = vmul.f32 %v5970_v51, %v5970_v51  ;;  %v4337_v3 = vpop.f32.mrb[68].mxu1  ;;  %4605 = vrsqrt.f32 %v2971_v8  ;;  %v3071_v57 = vmul.f32 %v4604_v32, %v5964_v19 }
 0x3b2   : > { %v2909_v26 = vsub.f32 %v4337_v3, %v2877_v27  ;;  %v2733_v22 = vpop.f32.mrb[69].mxu1  ;;  %4607 = vrsqrt.f32 %v2970_v49  ;;  %v3104_v0 = vmul.f32 %v3072_v38, %v3033_v24 }
 0x3b3   : > { %v2908_v36 = vsub.f32 %v2733_v22, %v2876_v39  ;;  %v3103_v18 = vmul.f32 %v3071_v57, %v3032_v30 }
 0x3b4   : > { %v2941_v55 = vmax.f32 %v2909_v26, 0.0  ;;  %v3143_v9 = vadd.f32 %v5988_v35, %v3104_v0  ;;  %v3035_v26 = vsub.f32 %v5714_v60, %v5953_v4  ;;  %v3037_v60 = vsub.f32 %v5729_v62, %v5966_v43 }
 0x3b5   : > { %v2940_v52 = vmax.f32 %v2908_v36, 0.0  ;;  %v5990_v37 = vpop.f32.mrb[70].mxu0  ;;  %v3142_v27 = vadd.f32 %v5988_v35, %v3103_v18  ;;  %v3034_v36 = vsub.f32 %v5717_v28, %v5957_v16 }
 0x3b6   : > { %v2973_v53 = vadd.f32 1e-05, %v2941_v55  ;;  %v2879_v56 = vmul.f32 %v5990_v37, %v5990_v37  ;;  %v5994_v25 = vpop.f32.mrb[71].mxu0  ;;  %v3175_v39 = vmul.f32 0.01, %v3143_v9  ;;  %v3039_v62 = vsub.f32 %v5745_v50, %v5990_v37 }
 0x3b7   : > { %v2972_v41 = vadd.f32 1e-05, %v2940_v52  ;;  %v2878_v59 = vmul.f32 %v5994_v25, %v5994_v25  ;;  %v4340_v31 = vpop.f32.mrb[70].mxu1  ;;  %v3174_v46 = vmul.f32 0.01, %v3142_v27  ;;  %v3038_v43 = vsub.f32 %v5749_v44, %v5994_v25 }
 0x3b8   : > { %4609 = vrsqrt.f32 %v2973_v53  ;;  %v2911_v23 = vsub.f32 %v4340_v31, %v2879_v56  ;;  %v2743_v8 = vpop.f32.mrb[71].mxu1  ;;  %v3207_v24 = vmax.f32 %v3143_v9, %v3175_v39  ;;  %v3036_v9 = vsub.f32 %v5733_v47, %v5970_v51 }
 0x3b9   : > { %4611 = vrsqrt.f32 %v2972_v41  ;;  %v2910_v49 = vsub.f32 %v2743_v8, %v2878_v59  ;;  %v3206_v0 = vmax.f32 %v3142_v27, %v3174_v46 }
 0x3ba   : > { %v2943_v3 = vmax.f32 %v2911_v23, 0.0  ;;  %v6002_v32 = vpop.f32.mrb[72].mxu0 }
 0x3bb   : > { %v2942_v22 = vmax.f32 %v2910_v49, 0.0  ;;  %v4606_v38 = vpop.eup %4605  ;;  %v2881_v57 = vmul.f32 %v6002_v32, %v6002_v32  ;;  %v6008_v55 = vpop.f32.mrb[73].mxu0  ;;  %v6016_v59 = vpack.c.bf16 %v3207_v24, %v3206_v0  ;;  %v3041_v39 = vsub.f32 %v5761_v21, %v6002_v32 }
 0x3bc   : > { %v2975_v30 = vadd.f32 1e-05, %v2943_v3  ;;  %v4608_v52 = vpop.eup %4607  ;;  %v3074_v18 = vmul.f32 %v4606_v38, %v5964_v19  ;;  %v2880_v53 = vmul.f32 %v6008_v55, %v6008_v55  ;;  %v4343_v56 = vpop.f32.mrb[72].mxu1  ;;  %v3040_v50 = vsub.f32 %v5765_v45, %v6008_v55 }
 0x3bd   : > { %v2974_v4 = vadd.f32 1e-05, %v2942_v22  ;;  %v3073_v28 = vmul.f32 %v4608_v52, %v5964_v19  ;;  %v2913_v16 = vsub.f32 %v4343_v56, %v2881_v57  ;;  %v2753_v41 = vpop.f32.mrb[73].mxu1 }
 0x3be   : > { %4613 = vrsqrt.f32 %v2975_v30  ;;  %v3106_v31 = vmul.f32 %v3074_v18, %v3035_v26  ;;  %v2912_v23 = vsub.f32 %v2753_v41, %v2880_v53 }
 0x3bf   : > { %4615 = vrsqrt.f32 %v2974_v4  ;;  %v3105_v8 = vmul.f32 %v3073_v28, %v3034_v36  ;;  %v2945_v27 = vmax.f32 %v2913_v16, 0.0 }
 0x3c0   : > { %v6024_v49 = vpop.f32.mrb[74].mxu0  ;;  %v2944_v3 = vmax.f32 %v2912_v23, 0.0  ;;  %v3145_v51 = vadd.f32 %v5988_v35, %v3106_v31 }
 0x3c1   : > { %v2883_v46 = vmul.f32 %v6024_v49, %v6024_v49  ;;  %v6030_v47 = vpop.f32.mrb[75].mxu0  ;;  %v2977_v37 = vadd.f32 1e-05, %v2945_v27  ;;  %v3144_v22 = vadd.f32 %v5988_v35, %v3105_v8  ;;  %v3043_v41 = vsub.f32 %v5776_v61, %v6024_v49 }
 0x3c2   : > { %v4610_v26 = vpop.eup %4609  ;;  %v2882_v44 = vmul.f32 %v6030_v47, %v6030_v47  ;;  %v4346_v25 = vpop.f32.mrb[74].mxu1  ;;  %v2976_v36 = vadd.f32 1e-05, %v2944_v3  ;;  %v3177_v0 = vmul.f32 0.01, %v3145_v51  ;;  %v3042_v27 = vsub.f32 %v5780_v14, %v6030_v47 }
 0x3c3   : > { %v4612_v24 = vpop.eup %4611  ;;  %v3076_v38 = vmul.f32 %v4610_v26, %v5964_v19  ;;  %v2915_v30 = vsub.f32 %v4346_v25, %v2883_v46  ;;  %v2763_v57 = vpop.f32.mrb[75].mxu1  ;;  %4617 = vrsqrt.f32 %v2977_v37  ;;  %v3176_v4 = vmul.f32 0.01, %v3144_v22 }
 0x3c4   : > { %v3075_v52 = vmul.f32 %v4612_v24, %v5964_v19  ;;  %v2914_v18 = vsub.f32 %v2763_v57, %v2882_v44  ;;  %4619 = vrsqrt.f32 %v2976_v36  ;;  %v3209_v28 = vmax.f32 %v3145_v51, %v3177_v0 }
 0x3c5   : > { %v3108_v53 = vmul.f32 %v3076_v38, %v3037_v60  ;;  %v2947_v56 = vmax.f32 %v2915_v30, 0.0  ;;  %v6042_v23 = vpop.f32.mrb[76].mxu0  ;;  %v3208_v8 = vmax.f32 %v3144_v22, %v3176_v4 }
 0x3c6   : > { %v3107_v16 = vmul.f32 %v3075_v52, %v3036_v9  ;;  %v2946_v31 = vmax.f32 %v2914_v18, 0.0  ;;  %v2885_v46 = vmul.f32 %v6042_v23, %v6042_v23  ;;  %v6048_v26 = vpop.f32.mrb[77].mxu0 }
 0x3c7   : > { %v2979_v3 = vadd.f32 1e-05, %v2947_v56  ;;  %v3147_v60 = vadd.f32 %v5988_v35, %v3108_v53  ;;  %v2884_v44 = vmul.f32 %v6048_v26, %v6048_v26  ;;  %v4349_v25 = vpop.f32.mrb[76].mxu1  ;;  %v6055_v22 = vpack.c.bf16 %v3209_v28, %v3208_v8 }
 0x3c8   : > { %v4614_v51 = vpop.eup %4613  ;;  %v2978_v9 = vadd.f32 1e-05, %v2946_v31  ;;  %v2917_v36 = vsub.f32 %v4349_v25, %v2885_v46  ;;  %v2773_v30 = vpop.f32.mrb[77].mxu1  ;;  %v3146_v57 = vadd.f32 %v5988_v35, %v3107_v16 }
 0x3c9   : > { %v4616_v24 = vpop.eup %4615  ;;  %v3078_v38 = vmul.f32 %v4614_v51, %v5964_v19  ;;  %4621 = vrsqrt.f32 %v2979_v3  ;;  %v2916_v52 = vsub.f32 %v2773_v30, %v2884_v44  ;;  %v3179_v18 = vmul.f32 0.01, %v3147_v60 }
 0x3ca   : > { %v3077_v0 = vmul.f32 %v4616_v24, %v5964_v19  ;;  %4623 = vrsqrt.f32 %v2978_v9  ;;  %v2949_v56 = vmax.f32 %v2917_v36, 0.0  ;;  %v3178_v31 = vmul.f32 0.01, %v3146_v57 }
 0x3cb   : > { %v3110_v4 = vmul.f32 %v3078_v38, %v3039_v62  ;;  %v2948_v51 = vmax.f32 %v2916_v52, 0.0 }
 0x3cc   : > { %v6062_v28 = vpop.f32.mrb[78].mxu0  ;;  %v3109_v8 = vmul.f32 %v3077_v0, %v3038_v43  ;;  %v2981_v9 = vadd.f32 1e-05, %v2949_v56  ;;  %v3210_v24 = vmax.f32 %v3146_v57, %v3178_v31  ;;  %v3211_v0 = vmax.f32 %v3147_v60, %v3179_v18 }
 0x3cd   : > { %v2887_v3 = vmul.f32 %v6062_v28, %v6062_v28  ;;  %v6068_v46 = vpop.f32.mrb[79].mxu0  ;;  %v4618_v38 = vpop.eup %4617  ;;  %v2980_v43 = vadd.f32 1e-05, %v2948_v51  ;;  %v6079_v37 = vadd.f32 %v5988_v35, %v3110_v4 }
 0x3ce   : > { %v2886_v62 = vmul.f32 %v6068_v46, %v6068_v46  ;;  %v4352_v25 = vpop.f32.mrb[78].mxu1  ;;  %v6075_v52 = vadd.f32 %v5988_v35, %v3109_v8  ;;  %v4620_v16 = vpop.eup %4619  ;;  %v3080_v53 = vmul.f32 %v4618_v38, %v5964_v19  ;;  %4625 = vrsqrt.f32 %v2981_v9 }
 0x3cf   : > { %v2919_v36 = vsub.f32 %v4352_v25, %v2887_v3  ;;  %v2783_v30 = vpop.f32.mrb[79].mxu1  ;;  %v3079_v44 = vmul.f32 %v4620_v16, %v5964_v19  ;;  %4627 = vrsqrt.f32 %v2980_v43  ;;  %v6084_v51 = vpack.c.bf16 %v3211_v0, %v3210_v24 }
 0x3d0   : > { %v2918_v56 = vsub.f32 %v2783_v30, %v2886_v62  ;;  %v6082_v31 = vpop.f32.mrb[80].mxu0  ;;  %v3112_v60 = vmul.f32 %v3080_v53, %v3041_v39  ;;  %v3180_v38 = vmul.f32 0.01, %v6075_v52 }
 0x3d1   : > { %v2951_v57 = vmax.f32 %v2919_v36, 0.0  ;;  %6527 = vst [vmem:[#allocation10_spill] sm:$0xff] %v6084_v51  ;;  %v2889_v8 = vmul.f32 %v6082_v31, %v6082_v31  ;;  %v3049_v4 = vsub.f32 %v5824_v42, %v6082_v31  ;;  %v6093_v3 = vpop.f32.mrb[81].mxu0  ;;  %v6098_v16 = vmul.f32 %v3079_v44, %v3040_v50 }
 0x3d2   : > { %v2950_v18 = vmax.f32 %v2918_v56, 0.0  ;;  %v2888_v62 = vmul.f32 %v6093_v3, %v6093_v3  ;;  %v3048_v21 = vsub.f32 %v5828_v2, %v6093_v3  ;;  %v4355_v32 = vpop.f32.mrb[80].mxu1  ;;  %v6106_v43 = vadd.f32 %v5988_v35, %v3112_v60 }
 0x3d3   : > { %v2983_v9 = vadd.f32 1e-05, %v2951_v57  ;;  %v4622_v39 = vpop.eup %4621  ;;  %v2921_v25 = vsub.f32 %v4355_v32, %v2889_v8  ;;  %v2793_v24 = vpop.f32.mrb[81].mxu1  ;;  %v3181_v36 = vmul.f32 0.01, %v6079_v37 }
 0x3d4   : > { %v2982_v53 = vadd.f32 1e-05, %v2950_v18  ;;  %v4624_v45 = vpop.eup %4623  ;;  %v3082_v55 = vmul.f32 %v4622_v39, %v5964_v19  ;;  %v2920_v50 = vsub.f32 %v2793_v24, %v2888_v62  ;;  %v6109_v44 = vpop.f32.mrb[82].mxu0 }
 0x3d5   : > { %4629 = vrsqrt.f32 %v2983_v9  ;;  %v3081_v30 = vmul.f32 %v4624_v45, %v5964_v19  ;;  %v2953_v0 = vmax.f32 %v2921_v25, 0.0  ;;  %v2891_v56 = vmul.f32 %v6109_v44, %v6109_v44  ;;  %v6115_v57 = vpop.f32.mrb[83].mxu0 }
 0x3d6   : > { %4631 = vrsqrt.f32 %v2982_v53  ;;  %v6120_v60 = vmul.f32 %v3082_v55, %v3043_v41  ;;  %v2952_v18 = vmax.f32 %v2920_v50, 0.0  ;;  %v2890_v9 = vmul.f32 %v6115_v57, %v6115_v57  ;;  %v4358_v62 = vpop.f32.mrb[82].mxu1 }
 0x3d7   : > { %v6129_v32 = vmul.f32 %v3081_v30, %v3042_v27  ;;  %v2985_v39 = vadd.f32 1e-05, %v2953_v0  ;;  %v2923_v61 = vsub.f32 %v4358_v62, %v2891_v56  ;;  %v2803_v49 = vpop.f32.mrb[83].mxu1  ;;  %v3212_v45 = vmax.f32 %v6075_v52, %v3180_v38 }
 0x3d8   : > { %v2984_v41 = vadd.f32 1e-05, %v2952_v18  ;;  %v2922_v25 = vsub.f32 %v2803_v49, %v2890_v9  ;;  %v6133_v24 = vpop.f32.mrb[84].mxu0  ;;  %v3213_v55 = vmax.f32 %v6079_v37, %v3181_v36  ;;  %v4626_v50 = vpop.eup %4625 }
 0x3d9   : > { %4633 = vrsqrt.f32 %v2985_v39  ;;  %v2955_v8 = vmax.f32 %v2923_v61, 0.0  ;;  %v2893_v14 = vmul.f32 %v6133_v24, %v6133_v24  ;;  %v6141_v27 = vpop.f32.mrb[85].mxu0  ;;  %v4628_v30 = vpop.eup %4627  ;;  %v3084_v0 = vmul.f32 %v4626_v50, %v5964_v19 }
 0x3da   : > { %4635 = vrsqrt.f32 %v2984_v41  ;;  %v2954_v56 = vmax.f32 %v2922_v25, 0.0  ;;  %v2892_v52 = vmul.f32 %v6141_v27, %v6141_v27  ;;  %v4361_v37 = vpop.f32.mrb[84].mxu1  ;;  %v3083_v38 = vmul.f32 %v4628_v30, %v5964_v19 }
 0x3db   : > { %v2987_v36 = vadd.f32 1e-05, %v2955_v8  ;;  %v2925_v9 = vsub.f32 %v4361_v37, %v2893_v14  ;;  %v2813_v62 = vpop.f32.mrb[85].mxu1  ;;  %v6528_v39 = vsub.f32 %v5793_v34, %v6042_v23  ;;  %v6156_v50 = vpack.c.bf16 %v3213_v55, %v3212_v45 }
 0x3dc   : > { %v2986_v49 = vadd.f32 1e-05, %v2954_v56  ;;  %v2924_v41 = vsub.f32 %v2813_v62, %v2892_v52  ;;  %v6154_v25 = vpop.f32.mrb[86].mxu0  ;;  %v6530_v30 = vsub.f32 %v5797_v12, %v6048_v26 }
 0x3dd   : > { %v6152_v61 = vmul.f32 %v3084_v0, %v6528_v39  ;;  %6529 = vst [vmem:[#allocation11_spill] sm:$0xff] %v6156_v50  ;;  %4637 = vrsqrt.f32 %v2987_v36  ;;  %v2957_v47 = vmax.f32 %v2925_v9, 0.0  ;;  %v2895_v14 = vmul.f32 %v6154_v25, %v6154_v25  ;;  %v6165_v37 = vpop.f32.mrb[87].mxu0 }
 0x3de   : > { %v6161_v8 = vmul.f32 %v3083_v38, %v6530_v30  ;;  %4639 = vrsqrt.f32 %v2986_v49  ;;  %v2956_v23 = vmax.f32 %v2924_v41, 0.0  ;;  %v2894_v45 = vmul.f32 %v6165_v37, %v6165_v37  ;;  %v4364_v55 = vpop.f32.mrb[86].mxu1 }
 0x3df   : > { %v4630_v34 = vpop.eup %4629  ;;  %v2989_v56 = vadd.f32 1e-05, %v2957_v47  ;;  %v2927_v38 = vsub.f32 %v4364_v55, %v2895_v14  ;;  %v2823_v36 = vpop.f32.mrb[87].mxu1  ;;  %v6179_v41 = vadd.f32 %v5988_v35, %v6098_v16  ;;  %v6531_v30 = vsub.f32 %v5808_v1, %v6062_v28 }
 0x3e0   : > { %v4632_v12 = vpop.eup %4631  ;;  %v3086_v26 = vmul.f32 %v4630_v34, %v5964_v19  ;;  %v2988_v62 = vadd.f32 1e-05, %v2956_v23  ;;  %v2926_v39 = vsub.f32 %v2823_v36, %v2894_v45  ;;  %v6175_v49 = vpop.f32.mrb[88].mxu0  ;;  %v6533_v23 = vsub.f32 %v5812_v11, %v6068_v46 }
 0x3e1   : > { %v3085_v9 = vmul.f32 %v4632_v12, %v5964_v19  ;;  %4641 = vrsqrt.f32 %v2989_v56  ;;  %v2959_v47 = vmax.f32 %v2927_v38, 0.0  ;;  %v2897_v14 = vmul.f32 %v6175_v49, %v6175_v49  ;;  %v6188_v55 = vpop.f32.mrb[89].mxu0 }
 0x3e2   : > { %v6184_v34 = vmul.f32 %v3086_v26, %v6531_v30  ;;  %4643 = vrsqrt.f32 %v2988_v62  ;;  %v2958_v16 = vmax.f32 %v2926_v39, 0.0  ;;  %v4367_v1 = vpop.f32.mrb[88].mxu1  ;;  %v2896_v56 = vmul.f32 %v6188_v55, %v6188_v55 }
 0x3e3   : > { %v6193_v45 = vmul.f32 %v3085_v9, %v6533_v23  ;;  %v4634_v28 = vpop.eup %4633  ;;  %v2991_v26 = vadd.f32 1e-05, %v2959_v47  ;;  %v2929_v36 = vsub.f32 %v4367_v1, %v2897_v14  ;;  %v2833_v30 = vpop.f32.mrb[89].mxu1  ;;  %v6205_v62 = vmul.f32 0.01, %v6179_v41 }
 0x3e4   : > { %6532 = vst [vmem:[#allocation20_spill] sm:$0xff] %v6184_v34  ;;  %v4636_v0 = vpop.eup %4635  ;;  %v3088_v11 = vmul.f32 %v4634_v28, %v5964_v19  ;;  %v2990_v46 = vadd.f32 1e-05, %v2958_v16  ;;  %v6202_v9 = vpop.f32.mrb[90].mxu0  ;;  %v6209_v39 = vadd.f32 %v5988_v35, %v6129_v32  ;;  %v2928_v12 = vsub.f32 %v2833_v30, %v2896_v56 }
 0x3e5   : > { %6534 = vst [vmem:[#allocation9_spill] sm:$0xff] %v6193_v45  ;;  %v3087_v47 = vmul.f32 %v4636_v0, %v5964_v19  ;;  %4645 = vrsqrt.f32 %v2991_v26  ;;  %v2961_v23 = vmax.f32 %v2929_v36, 0.0  ;;  %v6212_v14 = vpop.f32.mrb[91].mxu0  ;;  %v2899_v16 = vmul.f32 %v6202_v9, %v6202_v9 }
 0x3e6   : > { %4647 = vrsqrt.f32 %v2990_v46  ;;  %v2898_v28 = vmul.f32 %v6212_v14, %v6212_v14  ;;  %v4370_v38 = vpop.f32.mrb[90].mxu1  ;;  %v2960_v18 = vmax.f32 %v2928_v12, 0.0 }
 0x3e7   : > { %v4638_v32 = vpop.eup %4637  ;;  %v2993_v52 = vadd.f32 1e-05, %v2961_v23  ;;  %v2843_v26 = vpop.f32.mrb[91].mxu1  ;;  %v3119_v56 = vmul.f32 %v3087_v47, %v3048_v21  ;;  %v2931_v46 = vsub.f32 %v4370_v38, %v2899_v16  ;;  %v3120_v23 = vmul.f32 %v3088_v11, %v3049_v4 }
 0x3e8   : > { %v4640_v36 = vpop.eup %4639  ;;  %v3090_v30 = vmul.f32 %v4638_v32, %v5964_v19  ;;  %v2930_v1 = vsub.f32 %v2843_v26, %v2898_v28  ;;  %v6226_v53 = vpop.f32.mrb[92].mxu0  ;;  %v2992_v0 = vadd.f32 1e-05, %v2960_v18 }
 0x3e9   : > { %v3089_v12 = vmul.f32 %v4640_v36, %v5964_v19  ;;  %4649 = vrsqrt.f32 %v2993_v52  ;;  %v2901_v48 = vmul.f32 %v6226_v53, %v6226_v53  ;;  %v6234_v2 = vpop.f32.mrb[93].mxu0  ;;  %v2963_v3 = vmax.f32 %v2931_v46, 0.0 }
 0x3ea   : > { %v2962_v21 = vmax.f32 %v2930_v1, 0.0  ;;  %v2900_v47 = vmul.f32 %v6234_v2, %v6234_v2  ;;  %v4373_v16 = vpop.f32.mrb[92].mxu1  ;;  %4651 = vrsqrt.f32 %v2992_v0  ;;  %v3158_v52 = vadd.f32 %v5988_v35, %v3119_v56 }
 0x3eb   : > { %v4642_v42 = vpop.eup %4641  ;;  %v2933_v4 = vsub.f32 %v4373_v16, %v2901_v48  ;;  %v2853_v18 = vpop.f32.mrb[93].mxu1  ;;  %v2995_v1 = vadd.f32 1e-05, %v2963_v3  ;;  %v3159_v31 = vadd.f32 %v5988_v35, %v3120_v23 }
 0x3ec   : > { %v4644_v11 = vpop.eup %4643  ;;  %v3092_v28 = vmul.f32 %v4642_v42, %v5964_v19  ;;  %v2994_v32 = vadd.f32 1e-05, %v2962_v21  ;;  %v2932_v26 = vsub.f32 %v2853_v18, %v2900_v47  ;;  %v6244_v36 = vpop.f32.mrb[94].mxu0 }
 0x3ed   : > { %6535 = vst [vmem:[#allocation19_spill] sm:$0xff] %v6244_v36  ;;  %v3091_v46 = vmul.f32 %v4644_v11, %v5964_v19  ;;  %v2965_v38 = vmax.f32 %v2933_v4, 0.0  ;;  %v2903_v0 = vmul.f32 %v6244_v36, %v6244_v36  ;;  %v6251_v16 = vpop.f32.mrb[95].mxu0  ;;  %4653 = vrsqrt.f32 %v2995_v1 }
 0x3ee   : > { %v2964_v56 = vmax.f32 %v2932_v26, 0.0  ;;  %v2902_v3 = vmul.f32 %v6251_v16, %v6251_v16  ;;  %v4376_v47 = vpop.f32.mrb[94].mxu1  ;;  %4655 = vrsqrt.f32 %v2994_v32  ;;  %v3190_v26 = vmul.f32 0.01, %v3158_v52 }
 0x3ef   : > { %v4646_v42 = vpop.eup %4645  ;;  %v2997_v4 = vadd.f32 1e-05, %v2965_v38  ;;  %v2935_v18 = vsub.f32 %v4376_v47, %v2903_v0  ;;  %v2863_v11 = vpop.f32.mrb[95].mxu1  ;;  %v3191_v36 = vmul.f32 0.01, %v3159_v31  ;;  %v6536_v38 = vsub.f32 %v5843_v15, %v6115_v57 }
 0x3f0   : > { %v4648_v50 = vpop.eup %4647  ;;  %v3094_v48 = vmul.f32 %v4646_v42, %v5964_v19  ;;  %v2996_v34 = vadd.f32 1e-05, %v2964_v56  ;;  %v2934_v1 = vsub.f32 %v2863_v11, %v2902_v3  ;;  %v3222_v6 = vmax.f32 %v3158_v52, %v3190_v26 }
 0x3f1   : > { %v3093_v51 = vmul.f32 %v4648_v50, %v5964_v19  ;;  %4657 = vrsqrt.f32 %v2997_v4  ;;  %v2967_v45 = vmax.f32 %v2935_v18, 0.0  ;;  %v3121_v32 = vmul.f32 %v3089_v12, %v6536_v38 }
 0x3f2   : > { %4659 = vrsqrt.f32 %v2996_v34  ;;  %v2966_v21 = vmax.f32 %v2934_v1, 0.0  ;;  %v3223_v47 = vmax.f32 %v3159_v31, %v3191_v36  ;;  %v6537_v56 = vsub.f32 %v5838_v33, %v6109_v44 }
 0x3f3   : > { %v4650_v0 = vpop.eup %4649  ;;  %v2999_v23 = vadd.f32 1e-05, %v2967_v45  ;;  %v6538_v50 = vsub.f32 %v5859_v63, %v6141_v27  ;;  %v3160_v15 = vadd.f32 %v5988_v35, %v3121_v32  ;;  %v6541_v57 = vsub.f32 %v5854_v58, %v6133_v24 }
 0x3f4   : > { %v3122_v3 = vmul.f32 %v3090_v30, %v6537_v56  ;;  %v3096_v4 = vmul.f32 %v4650_v0, %v5964_v19  ;;  %v2998_v34 = vadd.f32 1e-05, %v2966_v21  ;;  %v4652_v44 = vpop.eup %4651  ;;  %v4449_v45 = vpack.c.bf16 %v3223_v47, %v3222_v6 }
 0x3f5   : > { %v3123_v42 = vmul.f32 %v3091_v46, %v6538_v50  ;;  %v3124_v33 = vmul.f32 %v3092_v28, %v6541_v57  ;;  %4661 = vrsqrt.f32 %v2999_v23  ;;  %v3095_v30 = vmul.f32 %v4652_v44, %v5964_v19 }
 0x3f6   : > { %v3161_v63 = vadd.f32 %v5988_v35, %v3122_v3  ;;  %4663 = vrsqrt.f32 %v2998_v34  ;;  %v3192_v12 = vmul.f32 0.01, %v3160_v15  ;;  %4451 = vmatprep.subr.msk.bf16.mxu0 %vm6272_vm3, %v4449_v45  ;;  %v6542_v58 = vsub.f32 %v5875_v20, %v6165_v37 }
 0x3f7   : > { %v3162_v27 = vadd.f32 %v5988_v35, %v3123_v42  ;;  %v3163_v31 = vadd.f32 %v5988_v35, %v3124_v33  ;;  %v6543_v6 = vsub.f32 %v5870_v17, %v6154_v25  ;;  %v4654_v21 = vpop.eup %4653  ;;  %4454 = vmatpush3.bf16.xpose.msk.msra.mxu0 %vm6272_vm3, %v6016_v59  ;;  %v6544_v1 = vsub.f32 %v5891_v13, %v6188_v55 }
 0x3f8   : > { %v3193_v36 = vmul.f32 0.01, %v3161_v63  ;;  %v3125_v24 = vmul.f32 %v3093_v51, %v6542_v58  ;;  %v3224_v18 = vmax.f32 %v3160_v15, %v3192_v12  ;;  %v6545_v38 = vsub.f32 %v5886_v7, %v6175_v49  ;;  %v4656_v51 = vpop.eup %4655 }
 0x3f9   : > { %v3194_v46 = vmul.f32 0.01, %v3162_v27  ;;  %v3126_v28 = vmul.f32 %v3094_v48, %v6543_v6  ;;  %v3195_v11 = vmul.f32 0.01, %v3163_v31  ;;  %v3127_v26 = vmul.f32 %v3095_v30, %v6544_v1 }
 0x3fa   : > { %v3128_v20 = vmul.f32 %v3096_v4, %v6545_v38  ;;  %v3098_v37 = vmul.f32 %v4654_v21, %v5964_v19  ;;  %v3225_v17 = vmax.f32 %v3161_v63, %v3193_v36  ;;  %v3164_v48 = vadd.f32 %v5988_v35, %v3125_v24 }
 0x3fb   : > { %v3226_v25 = vmax.f32 %v3162_v27, %v3194_v46  ;;  %v3097_v32 = vmul.f32 %v4656_v51, %v5964_v19  ;;  %v3227_v59 = vmax.f32 %v3163_v31, %v3195_v11  ;;  %v3165_v0 = vadd.f32 %v5988_v35, %v3126_v28  ;;  %v4658_v13 = vpop.eup %4657 }
 0x3fc   : > { %v3166_v23 = vadd.f32 %v5988_v35, %v3127_v26  ;;  %v4455_v55 = vpack.c.bf16 %v3225_v17, %v3224_v18  ;;  %v3196_v47 = vmul.f32 0.01, %v3164_v48  ;;  %v3167_v7 = vadd.f32 %v5988_v35, %v3128_v20  ;;  %v4660_v56 = vpop.eup %4659 }
 0x3fd   : > { %v3183_v49 = vmul.f32 0.01, %v6106_v43  ;;  %v3100_v3 = vmul.f32 %v4658_v13, %v5964_v19  ;;  %v4461_v50 = vpack.c.bf16 %v3227_v59, %v3226_v25  ;;  %v3197_v42 = vmul.f32 0.01, %v3165_v0  ;;  %v6551_v59 = vld [vmem:[#allocation8_spill] sm:$0xff] }
 0x3fe   : > { %v3198_v4 = vmul.f32 0.01, %v3166_v23  ;;  %v3099_v34 = vmul.f32 %v4660_v56, %v5964_v19  ;;  %4457 = vmatprep.subr.msk.bf16.mxu0 %vm6272_vm3, %v4455_v55  ;;  %v3228_v15 = vmax.f32 %v3164_v48, %v3196_v47  ;;  %v3199_v57 = vmul.f32 0.01, %v3167_v7 }
 0x3ff   : > { %v3214_v33 = vmax.f32 %v6179_v41, %v6205_v62  ;;  %v3229_v44 = vmax.f32 %v3165_v0, %v3197_v42  ;;  %v3215_v63 = vmax.f32 %v6106_v43, %v3183_v49  ;;  %v6546_v27 = vsub.f32 %v5907_v29, %v6212_v14  ;;  %v4662_v12 = vpop.eup %4661  ;;  %4460 = vmatpush3.bf16.xpose.msk.msra.mxu0 %vm6272_vm3, %v6055_v22 }
 0x400   : > { %v3230_v45 = vmax.f32 %v3166_v23, %v3198_v4  ;;  %v3231_v31 = vmax.f32 %v3167_v7, %v3199_v57  ;;  %v6547_v36 = vsub.f32 %v5902_v5, %v6202_v9  ;;  %v3153_v58 = vadd.f32 %v5988_v35, %v6120_v60  ;;  %v4664_v41 = vpop.eup %4663  ;;  %4463 = vmatprep.subr.msk.bf16.mxu0 %vm6272_vm3, %v4461_v50  ;;  %v6554_v7 = vld [vmem:[#allocation9_spill] sm:$0xff]  ;;  %v6556_v4 = vld [vmem:[#allocation20_spill] sm:$0xff] }
 0x401   : > { %v3129_v30 = vmul.f32 %v3097_v32, %v6546_v27  ;;  %v3184_v24 = vmul.f32 0.01, %v6209_v39  ;;  %v3102_v62 = vmul.f32 %v4662_v12, %v5964_v19  ;;  %v4467_v29 = vpack.c.bf16 %v3229_v44, %v3228_v15 }
 0x402   : > { %v3130_v46 = vmul.f32 %v3098_v37, %v6547_v36  ;;  %v4476_v43 = vpack.c.bf16 %v3215_v63, %v3214_v33  ;;  %v3101_v6 = vmul.f32 %v4664_v41, %v5964_v19  ;;  %v4473_v5 = vpack.c.bf16 %v3231_v31, %v3230_v45  ;;  %v6557_v36 = vld [vmem:[#allocation11_spill] sm:$0xff] }
 0x403   : > { %v3168_v14 = vadd.f32 %v5988_v35, %v3129_v30  ;;  %v3185_v9 = vmul.f32 0.01, %v3153_v58  ;;  %v3216_v21 = vmax.f32 %v6209_v39, %v3184_v24  ;;  %v6548_v18 = vsub.f32 %v5923_v54, %v6234_v2 }
 0x404   : > { %v3169_v60 = vadd.f32 %v5988_v35, %v3130_v46  ;;  %v6549_v11 = vsub.f32 %v5918_v40, %v6226_v53  ;;  %v3154_v38 = vadd.f32 %v5988_v35, %v6161_v8  ;;  %v3155_v20 = vadd.f32 %v5988_v35, %v6152_v61  ;;  %v6552_v8 = vld [vmem:[#allocation19_spill] sm:$0xff] }
 0x405   : > { %v3200_v28 = vmul.f32 0.01, %v3168_v14  ;;  %v3131_v22 = vmul.f32 %v3099_v34, %v6548_v18  ;;  %v3217_v19 = vmax.f32 %v3153_v58, %v3185_v9  ;;  %v6550_v54 = vsub.f32 %v5939_v10, %v6251_v16  ;;  %v6555_v10 = vld [vmem:[#allocation10_spill] sm:$0xff] }
 0x406   : > { %v3132_v1 = vmul.f32 %v3100_v3, %v6549_v11  ;;  %v3201_v26 = vmul.f32 0.01, %v3169_v60  ;;  %v3186_v53 = vmul.f32 0.01, %v3154_v38  ;;  %v3187_v25 = vmul.f32 0.01, %v3155_v20 }
 0x407   : > { %v3232_v51 = vmax.f32 %v3168_v14, %v3200_v28  ;;  %v3170_v37 = vadd.f32 %v5988_v35, %v3131_v22  ;;  %v3133_v2 = vmul.f32 %v3101_v6, %v6550_v54  ;;  %v4482_v40 = vpack.c.bf16 %v3217_v19, %v3216_v21  ;;  %4466 = vmatpush3.bf16.xpose.msk.msra.mxu0 %vm6272_vm3, %v6555_v10 }
 0x408   : > { %v3171_v39 = vadd.f32 %v5988_v35, %v3132_v1  ;;  %v3233_v17 = vmax.f32 %v3169_v60, %v3201_v26  ;;  %v6553_v0 = vsub.f32 %v6551_v59, %v6552_v8  ;;  %v3218_v55 = vmax.f32 %v3154_v38, %v3186_v53  ;;  %4469 = vmatprep.subr.msk.bf16.mxu0 %vm6272_vm3, %v4467_v29 }
 0x409   : > { %v3202_v48 = vmul.f32 0.01, %v3170_v37  ;;  %v3172_v61 = vadd.f32 %v5988_v35, %v3133_v2  ;;  %v3219_v47 = vmax.f32 %v3155_v20, %v3187_v25  ;;  %v3156_v49 = vadd.f32 %v5988_v35, %v6554_v7 }
 0x40a   : > { %v3203_v32 = vmul.f32 0.01, %v3171_v39  ;;  %v3134_v23 = vmul.f32 %v3102_v62, %v6553_v0  ;;  %v4479_v13 = vpack.c.bf16 %v3233_v17, %v3232_v51  ;;  %v3157_v34 = vadd.f32 %v5988_v35, %v6556_v4 }
 0x40b   : > { %v3234_v16 = vmax.f32 %v3170_v37, %v3202_v48  ;;  %v3204_v50 = vmul.f32 0.01, %v3172_v61  ;;  %v4488_v42 = vpack.c.bf16 %v3219_v47, %v3218_v55  ;;  %v3188_v15 = vmul.f32 0.01, %v3156_v49 }
 0x40c   : > { %v3235_v56 = vmax.f32 %v3171_v39, %v3203_v32  ;;  %v3173_v3 = vadd.f32 %v5988_v35, %v3134_v23  ;;  %v3189_v45 = vmul.f32 0.01, %v3157_v34  ;;  %v6558_v35 = vld [vmem:[#allocation18_spill] sm:$0xff]  ;;  %v4729_v46 = vmov 1966171168  }
 0x40d   : > { %v3236_v44 = vmax.f32 %v3172_v61, %v3204_v50  ;;  %v3220_v63 = vmax.f32 %v3156_v49, %v3188_v15  ;;  %v3415_v58 = vunpack.c.l.s4 %v4729_v46  ;;  %v3417_v24 = vlaneseq }
 0x40e   : > { %v4485_v57 = vpack.c.bf16 %v3235_v56, %v3234_v16  ;;  %v3205_v33 = vmul.f32 0.01, %v3173_v3  ;;  %v3221_v30 = vmax.f32 %v3157_v34, %v3189_v45  ;;  %v3240_v41 = vstv %s3239_s26  ;;  %s4669_s26 = sshll.u32 %s4730_s12, 4  ;;  %s4670_s26 = int_to_ptr.vmem [resolvable:$false] %s4669_s26 }
 0x40f   : > { %4472 = vmatpush3.bf16.xpose.msk.msra.mxu0 %vm6272_vm3, %v6557_v36  ;;  %v3416_v62 = vunpack.c.0.s8 %v3415_v58  ;;  %v3418_v29 = vshrl.u32 %v3417_v24, 7  ;;  %vm3431_vm4 = vcmp.lt.s32.totalorder %v3417_v24, 256  ;;  %s4671_s29 = scalar_lea.vmem %s4670_s26, 64  ;;  %p4672_p0 = scmp.lt.s32.totalorder %s6391_s21, %s4670_s26 }
 0x410   : > { %v3237_v27 = vmax.f32 %v3173_v3, %v3205_v33  ;;  %v4494_v31 = vpack.c.bf16 %v3221_v30, %v3220_v63  ;;  %4475 = vmatprep.subr.msk.bf16.mxu0 %vm6272_vm3, %v4473_v5  ;;  %p4673_p1 = scmp.lt.s32.totalorder %s4671_s29, %s4665_s18 }
 0x411   : > { %v3419_v52 = vsub.s32 %v3416_v62, %v3418_v29 }
 0x412   : > { %v4491_v12 = vpack.c.bf16 %v3237_v27, %v3236_v44  ;;  %p4674_p2 = por %p4673_p1, %p4672_p0 }
 0x414   : > { %p4675_p3 = pnand %p4674_p2, %p4668_p13 }
 0x417   : > { %4478 = vmatpush3.bf16.xpose.msk.msra.mxu0 %vm6272_vm3, %v4476_v43 }
 0x418   : > { %4481 = vmatprep.subr.msk.bf16.mxu0 %vm6272_vm3, %v4479_v13 }
 0x41f   : > { %4484 = vmatpush3.bf16.xpose.msk.msra.mxu0 %vm6272_vm3, %v4482_v40 }
 0x420   : > { %4487 = vmatprep.subr.msk.bf16.mxu0 %vm6272_vm3, %v4485_v57 }
 0x427   : > { %4490 = vmatpush3.bf16.xpose.msk.msra.mxu0 %vm6272_vm3, %v4488_v42 }
 0x428   : > { %4493 = vmatprep.subr.msk.bf16.mxu0 %vm6272_vm3, %v4491_v12 }
 0x42f   : > { %4496 = vmatpush3.bf16.xpose.msk.msra.mxu0 %vm6272_vm3, %v4494_v31 }
 0x436   : > { %4014 = vmatmul.mubr.msk.f32.vlgmr.msra.gmra.mrb[96].mxu0 %vm2197_vm2, %v6558_v35 }
 0x509   : > { %v3406_v43 = vpop.f32.mrb[96].mxu0 }
 0x50a   : > { %v3407_v14 = vadd.f32 %v3406_v43, %v3240_v41  ;;  %v3408_v6 = vpop.f32.mrb[97].mxu0 }
 0x50b   : > { %v3409_v5 = vadd.f32 %v3408_v6, %v3240_v41 }
 0x50d   : > { %v3413_v60 = vcombine.low %v3407_v14, %v3409_v5 }
 0x50f   : > { %v3420_v9 = vrot.slane %v3413_v60, %v3419_v52 }
 0x511   : > { %v3427_v28 = vrot.slane %v3420_v9, %v3419_v52 }
 0x513   : > { %3433 = vst.msk [vmem:[%s435_s17] sm:$0x3] %vm3431_vm4, %v3427_v28 }
 0x514   : > { %4678 = shalt.err (!%p4675_p3)
}
 0x515   : > { %s4679_s14 = scalar_lea.hbm %s6389_s24, 32  ;;  %s4683_s22 = scalar_lea.hbm %s6444_s13, 64 }
 0x516   : > { %p4680_p4 = scmp.ne.s32.totalorder %s6389_s24, %s4679_s14  ;;  %p4684_p9 = scmp.lt.u32.totalorder %s6389_s24, %s6444_s13 }
 0x517   : > { %p4685_p10 = scmp.lt.u32.totalorder %s4683_s22, %s4679_s14  ;;  %p4687_p12 = scmp.lt.u32.totalorder %s4679_s14, %s6389_s24 }
 0x518   : > { %p4681_p7 = pnand %p4680_p4, %p4839_p5 }
 0x519   : > { %p4686_p11 = por %p4685_p10, %p4684_p9 }
 0x51a   : > { %p4682_p8 = pneg %p4681_p7 }
 0x51b   : > { %p4688_p13 = por %p4687_p12, %p4686_p11 }
 0x51d   : > { %p4689_p0 = pnand %p4688_p13, %p4682_p8 }
 0x51f   : > { %4692 = shalt.err (!%p4689_p0)
}
 0x520   : > { %4497 = dma.vmem_to_hbm [thread:$0]  (%p4839_p5), %s6391_s21, 32, %s6389_s24, %s3435_s25  }
 0x521 PF: > { %p4503_p1 = scmp.ge.s32.totalorder %s4727_s30, 2  ;;  %s3461_s18 = sand.u32 1, %s4715_s27  }
 0x522   : > { %s3462_s26 = scalar_lea.sflag [#allocation4], %s3461_s18 }
 0x523   : > { %p4500_p2 = pnand %p4503_p1, %p4843_p6 }
 0x525   : > { %4710 = dma.done.wait (!%p4500_p2), %s3462_s26, 32  }
 0x526   : > { %4712 = vsyncadd (!%p4500_p2), %s3462_s26, 4294967264  ;;  %s6559_s29 = sld [smem:[#allocation6_spill]]  ;;  %s6560_s14 = sld [smem:[#allocation7_spill]] }
 0x527   : > { %p24_p3 = scmp.ge.s32.totalorder %s4827_s15, 4   ;;  %s6561_s27 = smov %s4719_s28 }
 0x528   : > { %s6564_s30 = smov %s4827_s15 }
 0x529   :  { %26 = sbr.rel (!%p24_p3) target bundleno = 5 (0x5), region = 107 }
 0x52c   : > { %s6562_s28 = smov %s6559_s29  ;;  %s6563_s29 = smov %s6560_s14 }
 0x530   :  { %3467 = vsyncpa [#allocation4], 1 }
 0x531   :  { %3469 = vsyncpa [#allocation4 + $0x1], 1 }

</bundles_post_ra>
